<compile_context>
chip_gen: v7x
topology: tpu7x:2x2x1
jax: 0.10.0
libtpu: 0.0.40
codegen_flags: <defaults>
</compile_context>

<pallas_src>
import functools

import jax
import jax.numpy as jnp
from jax import lax
from jax.experimental import pallas as pl
from jax.experimental.pallas import tpu as pltpu

MATMUL_DTYPE = jnp.bfloat16   # MXU-native operand dtype; accumulation stays f32
_NEG_INF = -1e30              # finite "minus infinity" for masking padded classes
_LANE = 128                   # class axis padded to a lane-dense multiple
_SUBLANE = 16                 # batch axis padded for bf16 sublane packing


def _round_up(n, m):
    return ((n + m - 1) // m) * m


def _tent_kernel(x_ref, w_hbm_ref, b_ref,
                 logits_ref, w_out_hbm_ref, b_new_ref, loss_ref,
                 w_vmem,
                 *, steps: int, lr: float, num_classes: int, num_rows: int,
                 matmul_dtype):
    """`steps` fused Tent forward-and-adapt iterations.

    x_ref         : (Bp, D)  f32  row-padded flattened input batch (read once)
    w_hbm_ref     : (Cp, D)  f32  class-padded weight, raw HBM (DMA'd in once)
    b_ref         : (1, Cp)  f32  class-padded bias
    logits_ref    : (Bp, Cp) f32  logits of the LAST forward pass (Tent output)
    w_out_hbm_ref : (Cp, D)  f32  updated weight, raw HBM (aliased with w input)
    b_new_ref     : (1, Cp)  f32  updated bias (aliased with b input)
    loss_ref      : (1, 1)   f32  mean softmax entropy of the last step
    w_vmem        : (Cp, D)  f32  the single resident VMEM copy of W
    """
    bp, cp = logits_ref.shape
    inv_b = 1.0 / float(num_rows)

    # Single VMEM copy of W: HBM -> scratch once, SGD-updated in place across
    # all steps, written back to the (aliased) HBM buffer once at the end.
    pltpu.sync_copy(w_hbm_ref, w_vmem)
    b_new_ref[...] = b_ref[...]

    x = x_ref[...]                             # (Bp, D), read once
    x_mm = x.astype(matmul_dtype)              # hoisted matmul-operand cast

    # Hoisted masks (broadcast_in_dim is not CSE'd by JAX -> keep out of loop).
    mask_classes = num_classes < cp
    if mask_classes:
        class_valid = lax.broadcasted_iota(jnp.int32, (1, cp), 1) < num_classes
        class_bias = jnp.where(class_valid, 0.0, _NEG_INF)           # (1, Cp)
        class_bias_bc = jnp.broadcast_to(class_bias, (bp, cp))       # (Bp, Cp)
    mask_rows = num_rows < bp
    if mask_rows:
        row_valid = lax.broadcasted_iota(jnp.int32, (bp, 1), 0) < num_rows
        row_scale = jnp.where(row_valid, inv_b, 0.0)                 # (Bp, 1)
        row_scale_bc = jnp.broadcast_to(row_scale, (bp, cp))         # (Bp, Cp)

    def do_step(write_outputs):
        w = w_vmem[...]                        # (Cp, D) f32 master weights
        b = b_new_ref[...]                     # (1, Cp)

        # --- forward: logits = x @ W^T + b (MXU, bf16 operands, f32 acc) ---
        logits = lax.dot_general(
            x_mm, w.astype(matmul_dtype),
            dimension_numbers=(((1,), (1,)), ((), ())),
            preferred_element_type=jnp.float32) + b                  # (Bp, Cp)

        # --- softmax entropy over the real classes.  Padded lanes are pushed
        # to -1e30, so their softmax probability is exactly 0 and they drop out
        # of every downstream sum/gradient without any jnp.where. ---
        zm = logits + class_bias_bc if mask_classes else logits
        m = jnp.max(zm, axis=1, keepdims=True)                       # (Bp, 1)
        z = zm - m
        e = jnp.exp(z)
        s = jnp.sum(e, axis=1, keepdims=True)                        # (Bp, 1)
        p = e * pl.reciprocal(s, approx=False)                       # (Bp, Cp)
        logp = z - jnp.log(s)                                        # (Bp, Cp)
        ent = -jnp.sum(p * logp, axis=1, keepdims=True)              # (Bp, 1)

        if write_outputs:                      # only the LAST step stores these
            logits_ref[...] = logits
            if mask_rows:
                loss_ref[...] = jnp.sum(ent * row_scale, axis=0, keepdims=True)
            else:
                loss_ref[...] = jnp.sum(ent, axis=0, keepdims=True) * inv_b

        # --- analytic backward of mean-entropy loss w.r.t. logits:
        # dH_i/dz_ik = -p_ik * (logp_ik + H_i); padded rows are zeroed by the
        # row mask, padded class lanes already have p == 0. ---
        g = -p * (logp + ent)
        g = g * row_scale_bc if mask_rows else g * inv_b             # (Bp, Cp)

        # --- parameter gradients + SGD step (optimizer.step / zero_grad) ---
        dW = lax.dot_general(
            g.astype(matmul_dtype), x_mm,
            dimension_numbers=(((0,), (0,)), ((), ())),
            preferred_element_type=jnp.float32)                      # (Cp, D)
        db = jnp.sum(g, axis=0, keepdims=True)                       # (1, Cp)

        w_vmem[...] = w - lr * dW
        b_new_ref[...] = b - lr * db

    # Peel the final iteration so logits/loss vector stores happen only once.
    if steps > 1:
        def body(_, carry):
            do_step(False)
            return carry
        lax.fori_loop(0, steps - 1, body, 0)
    do_step(True)

    # Write the adapted weights back to HBM (same buffer as the input thanks to
    # input_output_aliases -> no fresh HBM allocation).
    pltpu.sync_copy(w_vmem, w_out_hbm_ref)


@functools.partial(jax.jit,
                   static_argnames=("steps", "lr", "num_classes", "num_rows"))
def tent_adapt_padded(x_pad, w_pad, b_pad, *, steps, lr, num_classes, num_rows):
    """Fused Tent kernel on class-/row-padded operands (padded layout in & out).

    Production callers adapting over many batches should keep (w_pad, b_pad) in
    this padded layout across calls so there is no per-call pad/un-pad HBM
    traffic; the parameters are updated in place via input_output_aliases.
    """
    Bp, D = x_pad.shape
    Cp = w_pad.shape[0]

    kernel = functools.partial(_tent_kernel, steps=steps, lr=lr,
                               num_classes=num_classes, num_rows=num_rows,
                               matmul_dtype=MATMUL_DTYPE)

    # VMEM budget: x block (double-buffered), the single W working copy, the dW
    # transient, bf16 operand copies, softmax temporaries and headroom for
    # compiler-internal scratch.  Clamped to stay inside every chip's budget
    # (v5e default 16 MiB scoped, v7x ~56 MiB usable of 64 MiB physical).
    est = (2 * Bp * D * 4                      # x input block, double-buffered
           + 2 * Cp * D * 4                    # W working copy + dW transient
           + 2 * (Bp * D + Cp * D + Bp * Cp)   # bf16 matmul operand copies
           + 10 * Bp * Cp * 4                  # logits block + softmax temps
           + 16 * Cp * 4                       # bias blocks
           + (1 << 20))                        # headroom
    vmem_limit = int(min(max(est, 16 * 1024 * 1024), 50 * 1024 * 1024))

    return pl.pallas_call(
        kernel,
        grid=(1,),
        in_specs=[
            pl.BlockSpec((Bp, D), lambda i: (0, 0)),       # x  -> VMEM block
            pl.BlockSpec(memory_space=pl.ANY),             # W stays in HBM
            pl.BlockSpec((1, Cp), lambda i: (0, 0)),       # b  -> VMEM block
        ],
        out_specs=[
            pl.BlockSpec((Bp, Cp), lambda i: (0, 0)),      # logits (Tent output)
            pl.BlockSpec(memory_space=pl.ANY),             # updated W (HBM)
            pl.BlockSpec((1, Cp), lambda i: (0, 0)),       # updated b
            pl.BlockSpec((1, 1), lambda i: (0, 0)),        # entropy loss
        ],
        out_shape=[
            jax.ShapeDtypeStruct((Bp, Cp), jnp.float32),
            jax.ShapeDtypeStruct((Cp, D), jnp.float32),
            jax.ShapeDtypeStruct((1, Cp), jnp.float32),
            jax.ShapeDtypeStruct((1, 1), jnp.float32),
        ],
        scratch_shapes=[pltpu.VMEM((Cp, D), jnp.float32)], # single W copy
        # In-place SGD update of the (padded) parameters.
        input_output_aliases={1: 1, 2: 2},
        compiler_params=pltpu.CompilerParams(
            dimension_semantics=("arbitrary",),
            vmem_limit_bytes=vmem_limit),
    )(x_pad, w_pad, b_pad)


@functools.partial(jax.jit, static_argnames=("steps", "lr"))
def _tent_adapt(x_flat, W, b, *, steps, lr):
    """Pad to lane-/sublane-dense shapes, run the fused kernel, un-pad."""
    B, D = x_flat.shape
    C = W.shape[0]
    Bp = _round_up(B, _SUBLANE)                # sublane-friendly batch
    Cp = _round_up(C, _LANE)                   # lane-dense class axis

    x_pad = jnp.zeros((Bp, D), jnp.float32).at[:B, :].set(x_flat)
    W_pad = jnp.zeros((Cp, D), jnp.float32).at[:C, :].set(W.astype(jnp.float32))
    b_pad = jnp.zeros((1, Cp), jnp.float32).at[:, :C].set(
        b.astype(jnp.float32).reshape(1, C))

    logits_p, W_new_p, b_new_p, loss = tent_adapt_padded(
        x_pad, W_pad, b_pad, steps=steps, lr=lr, num_classes=C, num_rows=B)

    return (logits_p[:B, :C], W_new_p[:C, :], b_new_p[:, :C], loss[0, 0])


def tent_forward(x_nchw, W, b, *, steps=1, lr=1e-3):
    """Tent.forward: run `steps` fused forward-and-adapt iterations.

    Returns (outputs_of_last_step, updated_W, updated_b, last_loss).
    Episodic reset is simply restarting from the caller's saved (W, b) copies,
    so it needs no kernel work.
    NOTE: Tent is designed for batch >= 64-128; tiny batches leave the MXU
    mostly idle (M/K of the two matmuls scale with the batch).
    """
    if steps <= 0:
        raise ValueError("Tent requires at least 1 step to forward and update")
    B = x_nchw.shape[0]
    x_flat = x_nchw.reshape(B, -1).astype(jnp.float32)   # glue: NCHW -> (B, C*H*W)
    return _tent_adapt(x_flat, W, b, steps=steps, lr=lr)


def _reference(x_nchw, W, b, lr, steps=1):
    """Pure-JAX reference for `steps` Tent iterations (correctness check)."""
    B = x_nchw.shape[0]
    x = x_nchw.reshape(B, -1).astype(jnp.float32)
    logits = None
    loss = None
    for _ in range(steps):
        logits = x @ W.T + b
        logp = jax.nn.log_softmax(logits, axis=1)
        p = jnp.exp(logp)
        ent = -(p * logp).sum(axis=1)
        loss = ent.mean()
        g = (-p * (logp + ent[:, None])) / B
        W = W - lr * (g.T @ x)
        b = b - lr * g.sum(axis=0, keepdims=True)
    return logits, W, b, loss


if __name__ == "__main__":
    key = jax.random.PRNGKey(0)
    k_x, k_w = jax.random.split(key)

    B, C_in, H, Wd = 8, 3, 16, 16        # input batch, NCHW
    NUM_CLASSES = 10
    D = C_in * H * Wd
    LR = 1e-3

    x = jax.random.normal(k_x, (B, C_in, H, Wd), dtype=jnp.float32)
    W0 = 0.01 * jax.random.normal(k_w, (NUM_CLASSES, D), dtype=jnp.float32)
    b0 = jnp.zeros((1, NUM_CLASSES), dtype=jnp.float32)

    # --- single step (Tent default) ---
    logits, W1, b1, loss = tent_forward(x, W0, b0, steps=1, lr=LR)
    jax.block_until_ready((logits, W1, b1, loss))

    r_logits, r_W1, r_b1, r_loss = _reference(x, W0, b0, LR, steps=1)
    # bf16 matmul operands (f32 accumulate / f32 master weights) -> tolerances
    # on the forward logits/loss are bf16-limited; the SGD update itself is f32.
    assert jnp.allclose(logits, r_logits, atol=2e-2, rtol=1e-2)
    assert jnp.allclose(W1, r_W1, atol=1e-4, rtol=1e-3)
    assert jnp.allclose(b1, r_b1, atol=1e-5, rtol=1e-3)
    assert jnp.allclose(loss, r_loss, atol=1e-2, rtol=1e-3)

    # --- fused multi-step adaptation loop (steps > 1 inside one kernel) ---
    logits3, W3, b3, loss3 = tent_forward(x, W0, b0, steps=3, lr=LR)
    jax.block_until_ready((logits3, W3, b3, loss3))

    r_logits3, r_W3, r_b3, r_loss3 = _reference(x, W0, b0, LR, steps=3)
    assert jnp.allclose(logits3, r_logits3, atol=2e-2, rtol=1e-2)
    assert jnp.allclose(W3, r_W3, atol=1e-4, rtol=1e-3)
    assert jnp.allclose(b3, r_b3, atol=1e-5, rtol=1e-3)
    assert jnp.allclose(loss3, r_loss3, atol=1e-2, rtol=1e-3)

    print("KERNEL_OK")
</pallas_src>

<mosaic_0001>
module attributes {stable_mosaic.version = 11 : i64} {
  func.func @_tent_kernel(%arg0: i32, %arg1: memref<16x768xf32, #tpu.memory_space<vmem>>, %arg2: memref<128x768xf32, #tpu.memory_space<any>>, %arg3: memref<1x128xf32, #tpu.memory_space<vmem>>, %arg4: memref<16x128xf32, #tpu.memory_space<vmem>>, %arg5: memref<128x768xf32, #tpu.memory_space<any>>, %arg6: memref<1x128xf32, #tpu.memory_space<vmem>>, %arg7: memref<1x1xf32, #tpu.memory_space<vmem>>, %arg8: memref<128x768xf32, #tpu.memory_space<vmem>>) attributes {dimension_semantics = [#tpu.dimension_semantics<arbitrary>], iteration_bounds = array<i64: 1>, scalar_prefetch = 0 : i64, scratch_operands = 1 : i64, tpu.core_type = #tpu.core_type<tc>, window_params = [{pipeline_mode = #tpu.pipeline_mode<synchronous>, transform_indices = @transform_0, window_bounds = array<i64: 16, 768>}, {}, {pipeline_mode = #tpu.pipeline_mode<synchronous>, transform_indices = @transform_2, window_bounds = array<i64: 1, 128>}, {pipeline_mode = #tpu.pipeline_mode<synchronous>, transform_indices = @transform_3, window_bounds = array<i64: 16, 128>}, {}, {pipeline_mode = #tpu.pipeline_mode<synchronous>, transform_indices = @transform_5, window_bounds = array<i64: 1, 128>}, {pipeline_mode = #tpu.pipeline_mode<synchronous>, transform_indices = @transform_6, window_bounds = array<i64: 1, 1>}]} {
    "tpu.region"() ({
      %68 = tpu.sem_alloc : memref<!tpu.dma_semaphore, #tpu.memory_space<semaphore_mem>>
      tpu.enqueue_dma source(%arg2 : memref<128x768xf32, #tpu.memory_space<any>>) target(%arg8 : memref<128x768xf32, #tpu.memory_space<vmem>>) target_semaphore(%68 : memref<!tpu.dma_semaphore, #tpu.memory_space<semaphore_mem>>)
      tpu.wait_dma2 semaphore(%68 : memref<!tpu.dma_semaphore, #tpu.memory_space<semaphore_mem>>) src(%arg2 : memref<128x768xf32, #tpu.memory_space<any>>) dst(%arg8 : memref<128x768xf32, #tpu.memory_space<vmem>>)
      tpu.yield
    }) : () -> ()
    %c0 = arith.constant 0 : index
    %c0_0 = arith.constant 0 : index
    %0 = vector.load %arg3[%c0, %c0_0] : memref<1x128xf32, #tpu.memory_space<vmem>>, vector<1x128xf32>
    %c0_1 = arith.constant 0 : index
    %c0_2 = arith.constant 0 : index
    %1 = vector.load %arg6[%c0_1, %c0_2] : memref<1x128xf32, #tpu.memory_space<vmem>>, vector<1x128xf32>
    tpu.vector_store %arg6[%c0_1, %c0_2], %0 {strides = array<i32>} : memref<1x128xf32, #tpu.memory_space<vmem>>, vector<1x128xf32>,
    %c0_3 = arith.constant 0 : index
    %c0_4 = arith.constant 0 : index
    %2 = vector.load %arg1[%c0_3, %c0_4] : memref<16x768xf32, #tpu.memory_space<vmem>>, vector<16x768xf32>
    %3 = arith.truncf %2 : vector<16x768xf32> to vector<16x768xbf16>
    %4 = tpu.iota {dimensions = array<i32: 1>} : vector<1x128xi32>
    %c10_i32 = arith.constant 10 : i32
    %5 = vector.broadcast %c10_i32 : i32 to vector<1x128xi32>
    %6 = arith.cmpi slt, %4, %5 : vector<1x128xi32>
    %cst = arith.constant 0.000000e+00 : f32
    %cst_5 = arith.constant -1.000000e+30 : f32
    %7 = vector.broadcast %cst : f32 to vector<1x128xf32>
    %8 = vector.broadcast %cst_5 : f32 to vector<1x128xf32>
    %9 = arith.select %6, %7, %8 : vector<1x128xi1>, vector<1x128xf32>
    %10 = vector.shape_cast %9 : vector<1x128xf32> to vector<1x128xf32>
    %11 = vector.broadcast %10 : vector<1x128xf32> to vector<16x128xf32>
    %12 = tpu.iota {dimensions = array<i32: 0>} : vector<16x1xi32>
    %c8_i32 = arith.constant 8 : i32
    %13 = vector.broadcast %c8_i32 : i32 to vector<16x1xi32>
    %14 = arith.cmpi slt, %12, %13 : vector<16x1xi32>
    %cst_6 = arith.constant 1.250000e-01 : f32
    %cst_7 = arith.constant 0.000000e+00 : f32
    %15 = vector.broadcast %cst_6 : f32 to vector<16x1xf32>
    %16 = vector.broadcast %cst_7 : f32 to vector<16x1xf32>
    %17 = arith.select %14, %15, %16 : vector<16x1xi1>, vector<16x1xf32>
    %18 = vector.shape_cast %17 : vector<16x1xf32> to vector<16x1xf32>
    %19 = vector.broadcast %18 : vector<16x1xf32> to vector<16x128xf32>
    %c0_8 = arith.constant 0 : index
    %c0_9 = arith.constant 0 : index
    %20 = vector.load %arg8[%c0_8, %c0_9] : memref<128x768xf32, #tpu.memory_space<vmem>>, vector<128x768xf32>
    %c0_10 = arith.constant 0 : index
    %c0_11 = arith.constant 0 : index
    %21 = vector.load %arg6[%c0_10, %c0_11] : memref<1x128xf32, #tpu.memory_space<vmem>>, vector<1x128xf32>
    %22 = arith.truncf %20 : vector<128x768xf32> to vector<128x768xbf16>
    %cst_12 = arith.constant dense<0.000000e+00> : vector<16x128xf32>
    %23 = tpu.matmul %3, %22, %cst_12 {dimension_numbers = #tpu.dot_dimension_numbers<[1], [1], [0], [0], [0, 0, 1, 0], [], []>} : vector<16x768xbf16>, vector<128x768xbf16>, vector<16x128xf32> -> vector<16x128xf32>
    %24 = vector.broadcast %21 : vector<1x128xf32> to vector<16x128xf32>
    %25 = arith.addf %23, %24 : vector<16x128xf32>
    %26 = arith.addf %25, %11 : vector<16x128xf32>
    %cst_13 = arith.constant dense<0xFF800000> : vector<16xf32>
    %27 = vector.multi_reduction <maximumf>, %26, %cst_13 [1] : vector<16x128xf32> to vector<16xf32>
    %28 = vector.shape_cast %27 : vector<16xf32> to vector<16x1xf32>
    %29 = vector.broadcast %28 : vector<16x1xf32> to vector<16x128xf32>
    %30 = arith.subf %26, %29 : vector<16x128xf32>
    %31 = math.exp %30 : vector<16x128xf32>
    %cst_14 = arith.constant dense<0.000000e+00> : vector<16xf32>
    %32 = vector.multi_reduction <add>, %31, %cst_14 [1] : vector<16x128xf32> to vector<16xf32>
    %33 = vector.shape_cast %32 : vector<16xf32> to vector<16x1xf32>
    %34 = tpu.reciprocal %33 : vector<16x1xf32> -> vector<16x1xf32>
    %35 = vector.broadcast %34 : vector<16x1xf32> to vector<16x128xf32>
    %36 = arith.mulf %31, %35 : vector<16x128xf32>
    %37 = math.log %33 : vector<16x1xf32>
    %38 = vector.broadcast %37 : vector<16x1xf32> to vector<16x128xf32>
    %39 = arith.subf %30, %38 : vector<16x128xf32>
    %40 = arith.mulf %36, %39 : vector<16x128xf32>
    %cst_15 = arith.constant dense<0.000000e+00> : vector<16xf32>
    %41 = vector.multi_reduction <add>, %40, %cst_15 [1] : vector<16x128xf32> to vector<16xf32>
    %42 = vector.shape_cast %41 : vector<16xf32> to vector<16x1xf32>
    %cst_16 = arith.constant 0.000000e+00 : f32
    %43 = vector.broadcast %cst_16 : f32 to vector<16x1xf32>
    %44 = arith.subf %43, %42 : vector<16x1xf32>
    %c0_17 = arith.constant 0 : index
    %c0_18 = arith.constant 0 : index
    %45 = vector.load %arg4[%c0_17, %c0_18] : memref<16x128xf32, #tpu.memory_space<vmem>>, vector<16x128xf32>
    tpu.vector_store %arg4[%c0_17, %c0_18], %25 {strides = array<i32>} : memref<16x128xf32, #tpu.memory_space<vmem>>, vector<16x128xf32>,
    %46 = arith.mulf %44, %17 : vector<16x1xf32>
    %cst_19 = arith.constant dense<0.000000e+00> : vector<1xf32>
    %47 = vector.multi_reduction <add>, %46, %cst_19 [0] : vector<16x1xf32> to vector<1xf32>
    %48 = vector.shape_cast %47 : vector<1xf32> to vector<1x1xf32>
    %c0_20 = arith.constant 0 : index
    %c0_21 = arith.constant 0 : index
    %49 = vector.load %arg7[%c0_20, %c0_21] : memref<1x1xf32, #tpu.memory_space<vmem>>, vector<1x1xf32>
    tpu.vector_store %arg7[%c0_20, %c0_21], %48 {strides = array<i32>} : memref<1x1xf32, #tpu.memory_space<vmem>>, vector<1x1xf32>,
    %cst_22 = arith.constant 0.000000e+00 : f32
    %50 = vector.broadcast %cst_22 : f32 to vector<16x128xf32>
    %51 = arith.subf %50, %36 : vector<16x128xf32>
    %52 = vector.broadcast %44 : vector<16x1xf32> to vector<16x128xf32>
    %53 = arith.addf %39, %52 : vector<16x128xf32>
    %54 = arith.mulf %51, %53 : vector<16x128xf32>
    %55 = arith.mulf %54, %19 : vector<16x128xf32>
    %56 = arith.truncf %55 : vector<16x128xf32> to vector<16x128xbf16>
    %cst_23 = arith.constant dense<0.000000e+00> : vector<128x768xf32>
    %57 = tpu.matmul %56, %3, %cst_23 {dimension_numbers = #tpu.dot_dimension_numbers<[0], [0], [1], [1], [0, 1, 1, 1], [], []>} : vector<16x128xbf16>, vector<16x768xbf16>, vector<128x768xf32> -> vector<128x768xf32>
    %cst_24 = arith.constant dense<0.000000e+00> : vector<128xf32>
    %58 = vector.multi_reduction <add>, %55, %cst_24 [0] : vector<16x128xf32> to vector<128xf32>
    %59 = vector.shape_cast %58 : vector<128xf32> to vector<1x128xf32>
    %cst_25 = arith.constant 1.000000e-03 : f32
    %60 = vector.broadcast %cst_25 : f32 to vector<128x768xf32>
    %61 = arith.mulf %60, %57 : vector<128x768xf32>
    %62 = arith.subf %20, %61 : vector<128x768xf32>
    %c0_26 = arith.constant 0 : index
    %c0_27 = arith.constant 0 : index
    %63 = vector.load %arg8[%c0_26, %c0_27] : memref<128x768xf32, #tpu.memory_space<vmem>>, vector<128x768xf32>
    tpu.vector_store %arg8[%c0_26, %c0_27], %62 {strides = array<i32>} : memref<128x768xf32, #tpu.memory_space<vmem>>, vector<128x768xf32>,
    %cst_28 = arith.constant 1.000000e-03 : f32
    %64 = vector.broadcast %cst_28 : f32 to vector<1x128xf32>
    %65 = arith.mulf %64, %59 : vector<1x128xf32>
    %66 = arith.subf %21, %65 : vector<1x128xf32>
    %c0_29 = arith.constant 0 : index
    %c0_30 = arith.constant 0 : index
    %67 = vector.load %arg6[%c0_29, %c0_30] : memref<1x128xf32, #tpu.memory_space<vmem>>, vector<1x128xf32>
    tpu.vector_store %arg6[%c0_29, %c0_30], %66 {strides = array<i32>} : memref<1x128xf32, #tpu.memory_space<vmem>>, vector<1x128xf32>,
    "tpu.region"() ({
      %68 = tpu.sem_alloc : memref<!tpu.dma_semaphore, #tpu.memory_space<semaphore_mem>>
      tpu.enqueue_dma source(%arg8 : memref<128x768xf32, #tpu.memory_space<vmem>>) target(%arg5 : memref<128x768xf32, #tpu.memory_space<any>>) target_semaphore(%68 : memref<!tpu.dma_semaphore, #tpu.memory_space<semaphore_mem>>)
      tpu.wait_dma2 semaphore(%68 : memref<!tpu.dma_semaphore, #tpu.memory_space<semaphore_mem>>) src(%arg8 : memref<128x768xf32, #tpu.memory_space<vmem>>) dst(%arg5 : memref<128x768xf32, #tpu.memory_space<any>>)
      tpu.yield
    }) : () -> ()
    return
  }
  func.func @transform_0(%arg0: i32) -> (i32, i32) {
    %c0_i32 = arith.constant 0 : i32
    %c0_i32_0 = arith.constant 0 : i32
    %c0_i32_1 = arith.constant 0 : i32
    return %c0_i32, %c0_i32_0 : i32, i32
  }
  func.func @transform_2(%arg0: i32) -> (i32, i32) {
    %c0_i32 = arith.constant 0 : i32
    %c0_i32_0 = arith.constant 0 : i32
    %c0_i32_1 = arith.constant 0 : i32
    return %c0_i32, %c0_i32_0 : i32, i32
  }
  func.func @transform_3(%arg0: i32) -> (i32, i32) {
    %c0_i32 = arith.constant 0 : i32
    %c0_i32_0 = arith.constant 0 : i32
    %c0_i32_1 = arith.constant 0 : i32
    return %c0_i32, %c0_i32_0 : i32, i32
  }
  func.func @transform_5(%arg0: i32) -> (i32, i32) {
    %c0_i32 = arith.constant 0 : i32
    %c0_i32_0 = arith.constant 0 : i32
    %c0_i32_1 = arith.constant 0 : i32
    return %c0_i32, %c0_i32_0 : i32, i32
  }
  func.func @transform_6(%arg0: i32) -> (i32, i32) {
    %c0_i32 = arith.constant 0 : i32
    %c0_i32_0 = arith.constant 0 : i32
    %c0_i32_1 = arith.constant 0 : i32
    return %c0_i32, %c0_i32_0 : i32, i32
  }
}

</mosaic_0001>

<bundles_post_ra>
// kernel: tent_adapt_padded.1
= control target key start
LH: loop header
LB: loop body
LE: loop exit
PB: predicated region body
PF: predicated region fallthrough
CT: control target
= control target key end

     0   :  { %12 = vsyncpa [#allocation4], 0  ;;  %s1922_s0 = inlined_call_operand.vmem [shape: f32[16,768], index: 0, kind: input, shape index: {}]   ;;  %s1923_s1 = inlined_call_operand.hbm [shape: f32[128,768], index: 1, kind: input, shape index: {}, may-alias: {1,4}]   ;;  %s1924_s2 = inlined_call_operand.hbm [shape: f32[1,128], index: 2, kind: input, shape index: {}, may-alias: {2,5}]   ;;  %s1925_s3 = inlined_call_operand.hbm [shape: f32[16,128], index: 3, kind: output, shape index: {0}]   ;;  %s1926_s4 = inlined_call_operand.hbm [shape: f32[128,768], index: 4, kind: output, shape index: {1}, may-alias: {1,4}]   ;;  %s1927_s5 = inlined_call_operand.hbm [shape: f32[1,128], index: 5, kind: output, shape index: {2}, may-alias: {2,5}]   ;;  %s1928_s6 = inlined_call_operand.hbm [shape: f32[1,1], index: 6, kind: output, shape index: {3}]  }
   0x1   :  { %13 = vsyncpa [#allocation5], 0 }
   0x2   :  { %14 = vsyncpa [#allocation8], 0  ;;  %s1355_s21 = smov [#allocation3]   ;;  %s1213_s25 = scalar_lea.hbm %s1924_s2, 16 }
   0x3   :  { %s23_s22 = sshll.u32 %s1355_s21, 4  ;;  %p1214_p0 = scmp.ne.s32.totalorder %s1924_s2, %s1213_s25  ;;  %s24_s22 = int_to_ptr.vmem [resolvable:$true] %s23_s22 }
   0x4   :  { %p1217_p1 = scmp.lt.u32.totalorder %s1213_s25, %s1924_s2 }
   0x6   :  { %p1219_p2 = pnand %p1217_p1, %p1214_p0 }
   0x8   :  { %1222 = shalt.err (!%p1219_p2)
}
   0x9   :  { %s1223_s30 = scalar_lea.vmem %s24_s22, 16  ;;  %s1227_s7 = scalar_lea.vmem %s24_s22, 32 }
   0xa   :  { %p1224_p3 = scmp.ne.s32.totalorder %s24_s22, %s1223_s30  ;;  %p1228_p4 = scmp.lt.s32.totalorder %s24_s22, %s24_s22 }
   0xb   :  { %p1229_p5 = scmp.lt.s32.totalorder %s1227_s7, %s1223_s30 }
   0xd   :  { %p1230_p6 = por %p1229_p5, %p1228_p4 }
   0xf   :  { %p1231_p7 = pnand %p1230_p6, %p1224_p3 }
  0x11   :  { %1234 = shalt.err (!%p1231_p7)
}
  0x12   :  { %26 = dma.hbm_to_vmem [thread:$0]  %s1924_s2, 16, %s24_s22, [#allocation4]  }
  0x13   :  { %1345 = dma.done.wait [#allocation4], 16  }
  0x14   :  { %1346 = vsyncadd [#allocation4], 4294967280 }
  0x15   :  { %s1356_s10 = smov [#allocation2]   ;;  %s1235_s14 = scalar_lea.hbm %s1923_s1, 12288 }
  0x16   :  { %s38_s11 = sshll.u32 %s1356_s10, 4  ;;  %p1236_p8 = scmp.ne.s32.totalorder %s1923_s1, %s1235_s14  ;;  %s1411_s11 = int_to_ptr.vmem [resolvable:$true] %s38_s11 }
  0x17   :  { %p1239_p9 = scmp.lt.u32.totalorder %s1235_s14, %s1923_s1 }
  0x19   :  { %p1241_p10 = pnand %p1239_p9, %p1236_p8 }
  0x1b   :  { %1244 = shalt.err (!%p1241_p10)  }
  0x1c   :  { %s1245_s2 = scalar_lea.vmem %s1411_s11, 12288  ;;  %p1250_p12 = scmp.lt.s32.totalorder %s1411_s11, %s1411_s11 }
  0x1d   :  { %p1246_p11 = scmp.ne.s32.totalorder %s1411_s11, %s1245_s2  ;;  %p1251_p13 = scmp.lt.s32.totalorder %s1245_s2, %s1245_s2 }
  0x1f   :  { %p1252_p0 = por %p1251_p13, %p1250_p12 }
  0x21   :  { %p1426_p1 = pnand %p1252_p0, %p1246_p11 }
  0x23   :  { %1256 = shalt.err (!%p1426_p1)  }
  0x24   :  { %41 = dma.hbm_to_vmem [thread:$0]  %s1923_s1, 12288, %s1411_s11, [#allocation10] }
  0x25   :  { %1347 = dma.done.wait [#allocation10], 12288 }
  0x26   :  { %1348 = vsyncadd [#allocation10], 4294955008  ;;  %v1436_v0 = vld [vmem:[#allocation2 + $0x8] sm:$0xff]  ;;  %v1438_v1 = vld [vmem:[#allocation2 + $0x38] sm:$0xff]  ;;  %vm396_vm1 = vcmask 0   ;;  %vm423_vm2 = vcmask 130048  }
  0x27   :  { %v1440_v2 = vld [vmem:[#allocation2] sm:$0xff]  ;;  %v175_v3 = vpack.c.bf16 %v1438_v1, %v1436_v0  ;;  %v1444_v4 = vld [vmem:[#allocation2 + $0x30] sm:$0xff]  ;;  %v1446_v5 = vld [vmem:[#allocation2 + $0x68] sm:$0xff] }
  0x28   :  { %v1448_v6 = vld [vmem:[#allocation2 + $0x98] sm:$0xff]  ;;  %v174_v7 = vpack.c.bf16 %v1444_v4, %v1440_v2  ;;  %v1454_v9 = vld [vmem:[#allocation2 + $0x60] sm:$0xff]  ;;  %v1456_v10 = vld [vmem:[#allocation2 + $0x90] sm:$0xff] }
  0x29   :  { %v181_v8 = vpack.c.bf16 %v1448_v6, %v1446_v5  ;;  %228 = vmatprep.subr.bf16.mxu0 %v175_v3  ;;  %v1458_v11 = vld [vmem:[#allocation2 + $0xc8] sm:$0xff]  ;;  %v1460_v12 = vld [vmem:[#allocation2 + $0xf8] sm:$0xff]  ;;  %v180_v13 = vpack.c.bf16 %v1456_v10, %v1454_v9  ;;  %v48_v18 = vld [vmem:[%s1922_s0] sm:$0xff] }
  0x2a   :  { %229 = vmatpush1.bf16.xpose.msra.mxu0 %v174_v7  ;;  %v187_v14 = vpack.c.bf16 %v1460_v12, %v1458_v11  ;;  %v49_v15 = vld [vmem:[%s1922_s0 + $0x8] sm:$0xff]  ;;  %v55_v16 = vld [vmem:[%s1922_s0 + $0x38] sm:$0xff]  ;;  %v54_v19 = vld [vmem:[%s1922_s0 + $0x30] sm:$0xff] }
  0x2b   :  { %230 = vmatprep.subr.bf16.mxu0 %v181_v8  ;;  %v61_v17 = vpack.c.bf16 %v55_v16, %v49_v15  ;;  %v1478_v20 = vld [vmem:[#allocation2 + $0xc0] sm:$0xff]  ;;  %v1480_v21 = vld [vmem:[#allocation2 + $0xf0] sm:$0xff]  ;;  %v60_v22 = vpack.c.bf16 %v54_v19, %v48_v18  ;;  %v1482_v23 = vld [vmem:[#allocation2 + $0x128] sm:$0xff] }
  0x2c   :  { %v1484_v24 = vld [vmem:[#allocation2 + $0x158] sm:$0xff]  ;;  %v186_v25 = vpack.c.bf16 %v1480_v21, %v1478_v20  ;;  %v1490_v27 = vld [vmem:[#allocation2 + $0x120] sm:$0xff]  ;;  %v1492_v28 = vld [vmem:[#allocation2 + $0x150] sm:$0xff] }
  0x2d   :  { %260 = vmatprep.mubr.bf16.mxu0 %v61_v17  ;;  %448 = vmatprep.subr.bf16.mxu1 %v61_v17  ;;  %v193_v26 = vpack.c.bf16 %v1484_v24, %v1482_v23  ;;  %v1494_v29 = vld [vmem:[#allocation2 + $0x188] sm:$0xff]  ;;  %v1496_v30 = vld [vmem:[#allocation2 + $0x1b8] sm:$0xff]  ;;  %v192_v33 = vpack.c.bf16 %v1492_v28, %v1490_v27  ;;  %v1508_v36 = vld [vmem:[#allocation2 + $0x180] sm:$0xff] }
  0x2e   :  { %449 = vmatpush1.bf16.msra.mxu1 %v60_v22  ;;  %v51_v31 = vld [vmem:[%s1922_s0 + $0x18] sm:$0xff]  ;;  %v57_v32 = vld [vmem:[%s1922_s0 + $0x48] sm:$0xff]  ;;  %v199_v35 = vpack.c.bf16 %v1496_v30, %v1494_v29  ;;  %v1510_v37 = vld [vmem:[#allocation2 + $0x1b0] sm:$0xff] }
  0x2f   :  { %v63_v34 = vpack.c.bf16 %v57_v32, %v51_v31  ;;  %v1512_v38 = vld [vmem:[#allocation2 + $0x1e8] sm:$0xff]  ;;  %v1514_v39 = vld [vmem:[#allocation2 + $0x218] sm:$0xff]  ;;  %v198_v40 = vpack.c.bf16 %v1510_v37, %v1508_v36  ;;  %v1520_v42 = vld [vmem:[#allocation2 + $0x1e0] sm:$0xff] }
  0x30   :  { %v205_v41 = vpack.c.bf16 %v1514_v39, %v1512_v38  ;;  %v1522_v43 = vld [vmem:[#allocation2 + $0x210] sm:$0xff]  ;;  %v1524_v44 = vld [vmem:[#allocation2 + $0x248] sm:$0xff]  ;;  %v1526_v45 = vld [vmem:[#allocation2 + $0x278] sm:$0xff] }
  0x31   :  { %561 = vmatprep.subr.bf16.mxu1 %v63_v34  ;;  %v204_v46 = vpack.c.bf16 %v1522_v43, %v1520_v42  ;;  %v211_v47 = vpack.c.bf16 %v1526_v45, %v1524_v44  ;;  %v1532_v48 = vld [vmem:[#allocation2 + $0x240] sm:$0xff]  ;;  %v1534_v49 = vld [vmem:[#allocation2 + $0x270] sm:$0xff]  ;;  %v1536_v50 = vld [vmem:[#allocation2 + $0x2a8] sm:$0xff] }
  0x32   :  { %231 = vmatpush1.bf16.xpose.msra.mxu0 %v180_v13  ;;  %v1538_v51 = vld [vmem:[#allocation2 + $0x2d8] sm:$0xff]  ;;  %v210_v52 = vpack.c.bf16 %v1534_v49, %v1532_v48  ;;  %v1544_v54 = vld [vmem:[#allocation2 + $0x2a0] sm:$0xff]  ;;  %v1546_v55 = vld [vmem:[#allocation2 + $0x2d0] sm:$0xff] }
  0x33   :  { %232 = vmatprep.subr.bf16.mxu0 %v187_v14  ;;  %v217_v53 = vpack.c.bf16 %v1538_v51, %v1536_v50  ;;  %v1548_v56 = vld [vmem:[#allocation2 + $0x18] sm:$0xff]  ;;  %v1550_v57 = vld [vmem:[#allocation2 + $0x48] sm:$0xff]  ;;  %v216_v58 = vpack.c.bf16 %v1546_v55, %v1544_v54  ;;  %v1556_v60 = vld [vmem:[#allocation2 + $0x10] sm:$0xff] }
  0x34   :  { %1979 = vst [vmem:[#allocation23_spill] sm:$0xff] %v1550_v57  ;;  %v177_v59 = vpack.c.bf16 %v1550_v57, %v1548_v56  ;;  %v1558_v61 = vld [vmem:[#allocation2 + $0x40] sm:$0xff]  ;;  %v1560_v62 = vld [vmem:[#allocation2 + $0x78] sm:$0xff]  ;;  %v1562_v63 = vld [vmem:[#allocation2 + $0xa8] sm:$0xff] }
  0x35   :  { %1980 = vst [vmem:[#allocation24_spill] sm:$0xff] %v1560_v62  ;;  %1981 = vst [vmem:[#allocation25_spill] sm:$0xff] %v1562_v63  ;;  %v176_v3 = vpack.c.bf16 %v1558_v61, %v1556_v60  ;;  %v183_v7 = vpack.c.bf16 %v1562_v63, %v1560_v62  ;;  %v46_v8 = vld [vmem:[#allocation3] sm:$0x1]  ;;  %v1568_v13 = vld [vmem:[#allocation2 + $0x70] sm:$0xff] }
  0x36   :  { %47 = vst [vmem:[#allocation7] sm:$0x1] %v46_v8  ;;  %1982 = vst [vmem:[#allocation26_spill] sm:$0xff] %v1568_v13  ;;  %v1570_v14 = vld [vmem:[#allocation2 + $0xa0] sm:$0xff]  ;;  %v1572_v15 = vld [vmem:[#allocation2 + $0xd8] sm:$0xff] }
  0x37   :  { %1983 = vst [vmem:[#allocation27_spill] sm:$0xff] %v1570_v14  ;;  %1984 = vst [vmem:[#allocation28_spill] sm:$0xff] %v1572_v15  ;;  %v1574_v16 = vld [vmem:[#allocation2 + $0x108] sm:$0xff]  ;;  %v182_v17 = vpack.c.bf16 %v1570_v14, %v1568_v13  ;;  %v1580_v19 = vld [vmem:[#allocation2 + $0xd0] sm:$0xff] }
  0x38   :  { %1985 = vst [vmem:[#allocation29_spill] sm:$0xff] %v1574_v16  ;;  %v189_v18 = vpack.c.bf16 %v1574_v16, %v1572_v15  ;;  %1986 = vst [vmem:[#allocation30_spill] sm:$0xff] %v1580_v19  ;;  %v1618_v8 = vld [vmem:[#allocation2 + $0x220] sm:$0xff]  ;;  %v1975_v15 = vmov 0  }
  0x39   :  { %1999 = vst [vmem:[#allocation43_spill] sm:$0xff] %v1618_v8  ;;  %480 = vmatprep.mubr.bf16.mxu1 %v1975_v15 }
  0x3a   :  { %233 = vmatpush1.bf16.xpose.msra.mxu0 %v186_v25  ;;  %v1584_v25 = vld [vmem:[#allocation2 + $0x138] sm:$0xff] }
  0x3b   :  { %234 = vmatprep.subr.bf16.mxu0 %v193_v26  ;;  %1988 = vst [vmem:[#allocation32_spill] sm:$0xff] %v1584_v25  ;;  %v1586_v26 = vld [vmem:[#allocation2 + $0x168] sm:$0xff] }
  0x3c   :  { %1989 = vst [vmem:[#allocation33_spill] sm:$0xff] %v1586_v26  ;;  %v195_v32 = vpack.c.bf16 %v1586_v26, %v1584_v25  ;;  %v154_v26 = vld [vmem:[#allocation2 + $0x268] sm:$0xff] }
  0x42   :  { %235 = vmatpush1.bf16.xpose.msra.mxu0 %v192_v33  ;;  %v1592_v33 = vld [vmem:[#allocation2 + $0x130] sm:$0xff] }
  0x43   :  { %236 = vmatprep.subr.bf16.mxu0 %v199_v35  ;;  %1990 = vst [vmem:[#allocation34_spill] sm:$0xff] %v1592_v33  ;;  %v1596_v35 = vld [vmem:[#allocation2 + $0x198] sm:$0xff] }
  0x44   :  { %1992 = vst [vmem:[#allocation36_spill] sm:$0xff] %v1596_v35 }
  0x4a   :  { %237 = vmatpush1.bf16.xpose.msra.mxu0 %v198_v40  ;;  %v1598_v40 = vld [vmem:[#allocation2 + $0x1c8] sm:$0xff] }
  0x4b   :  { %238 = vmatprep.subr.bf16.mxu0 %v205_v41  ;;  %1993 = vst [vmem:[#allocation37_spill] sm:$0xff] %v1598_v40 }
  0x52   :  { %239 = vmatpush1.bf16.xpose.msra.mxu0 %v204_v46  ;;  %v201_v46 = vpack.c.bf16 %v1598_v40, %v1596_v35  ;;  %v1682_v40 = vld [vmem:[#allocation2 + $0x80] sm:$0xff] }
  0x53   :  { %240 = vmatprep.subr.bf16.mxu0 %v211_v47  ;;  %v1604_v47 = vld [vmem:[#allocation2 + $0x190] sm:$0xff]  ;;  %2014 = vst [vmem:[#allocation58_spill] sm:$0xff] %v1682_v40  ;;  %v1712_v35 = vld [vmem:[#allocation2 + $0x1a0] sm:$0xff] }
  0x54   :  { %1994 = vst [vmem:[#allocation38_spill] sm:$0xff] %v1604_v47  ;;  %2024 = vst [vmem:[#allocation68_spill] sm:$0xff] %v1712_v35 }
  0x5a   :  { %241 = vmatpush1.bf16.xpose.msra.mxu0 %v210_v52  ;;  %v1606_v52 = vld [vmem:[#allocation2 + $0x1c0] sm:$0xff] }
  0x5b   :  { %242 = vmatprep.subr.bf16.mxu0 %v217_v53  ;;  %1995 = vst [vmem:[#allocation39_spill] sm:$0xff] %v1606_v52  ;;  %v1608_v53 = vld [vmem:[#allocation2 + $0x1f8] sm:$0xff] }
  0x5c   :  { %1996 = vst [vmem:[#allocation40_spill] sm:$0xff] %v1608_v53 }
  0x62   :  { %243 = vmatpush1.bf16.xpose.msra.mxu0 %v216_v58  ;;  %v1610_v58 = vld [vmem:[#allocation2 + $0x228] sm:$0xff] }
  0x63   :  { %269 = vmatprep.subr.bf16.mxu0 %v177_v59  ;;  %1997 = vst [vmem:[#allocation41_spill] sm:$0xff] %v1610_v58  ;;  %v200_v59 = vpack.c.bf16 %v1606_v52, %v1604_v47  ;;  %v1684_v52 = vld [vmem:[#allocation2 + $0xb0] sm:$0xff] }
  0x64   :  { %2015 = vst [vmem:[#allocation59_spill] sm:$0xff] %v1684_v52  ;;  %v147_v47 = vld [vmem:[#allocation2 + $0x230] sm:$0xff] }
  0x69   :  { %261 = vmatmul.mubr.bf16.vlgmr.msra.gmra.mrb[0].mxu0 %v60_v22  ;;  %v1582_v22 = vld [vmem:[#allocation2 + $0x100] sm:$0xff] }
  0x6a   :  { %270 = vmatpush1.bf16.xpose.msra.mxu0 %v176_v3  ;;  %301 = vmatprep.mubr.bf16.mxu0 %v63_v34  ;;  %1987 = vst [vmem:[#allocation31_spill] sm:$0xff] %v1582_v22  ;;  %v188_v31 = vpack.c.bf16 %v1582_v22, %v1580_v19  ;;  %v1594_v34 = vld [vmem:[#allocation2 + $0x160] sm:$0xff]  ;;  %v207_v3 = vpack.c.bf16 %v1610_v58, %v1608_v53 }
  0x6b   :  { %271 = vmatprep.subr.bf16.mxu0 %v183_v7  ;;  %1991 = vst [vmem:[#allocation35_spill] sm:$0xff] %v1594_v34  ;;  %v194_v41 = vpack.c.bf16 %v1594_v34, %v1592_v33  ;;  %v1616_v7 = vld [vmem:[#allocation2 + $0x1f0] sm:$0xff]  ;;  %v160_v34 = vld [vmem:[#allocation2 + $0x298] sm:$0xff] }
  0x6c   :  { %1998 = vst [vmem:[#allocation42_spill] sm:$0xff] %v1616_v7 }
  0x72   :  { %272 = vmatpush1.bf16.xpose.msra.mxu0 %v182_v17  ;;  %v1620_v17 = vld [vmem:[#allocation2 + $0x258] sm:$0xff] }
  0x73   :  { %273 = vmatprep.subr.bf16.mxu0 %v189_v18  ;;  %2000 = vst [vmem:[#allocation44_spill] sm:$0xff] %v1620_v17  ;;  %v1622_v18 = vld [vmem:[#allocation2 + $0x288] sm:$0xff] }
  0x74   :  { %2001 = vst [vmem:[#allocation45_spill] sm:$0xff] %v1622_v18 }
  0x7a   :  { %274 = vmatpush1.bf16.xpose.msra.mxu0 %v188_v31  ;;  %v206_v31 = vpack.c.bf16 %v1618_v8, %v1616_v7  ;;  %v1640_v8 = vld [vmem:[#allocation2 + $0x2b0] sm:$0xff] }
  0x7b   :  { %275 = vmatprep.subr.bf16.mxu0 %v195_v32  ;;  %v213_v32 = vpack.c.bf16 %v1622_v18, %v1620_v17  ;;  %2006 = vst [vmem:[#allocation50_spill] sm:$0xff] %v1640_v8  ;;  %v1646_v18 = vld [vmem:[#allocation2 + $0x58] sm:$0xff] }
  0x7c   :  { %2009 = vst [vmem:[#allocation53_spill] sm:$0xff] %v1646_v18 }
  0x82   :  { %276 = vmatpush1.bf16.xpose.msra.mxu0 %v194_v41  ;;  %v1628_v41 = vld [vmem:[#allocation2 + $0x250] sm:$0xff] }
  0x83   :  { %277 = vmatprep.subr.bf16.mxu0 %v201_v46  ;;  %2002 = vst [vmem:[#allocation46_spill] sm:$0xff] %v1628_v41  ;;  %v1630_v46 = vld [vmem:[#allocation2 + $0x280] sm:$0xff] }
  0x84   :  { %2003 = vst [vmem:[#allocation47_spill] sm:$0xff] %v1630_v46  ;;  %v212_v58 = vpack.c.bf16 %v1630_v46, %v1628_v41 }
  0x8a   :  { %278 = vmatpush1.bf16.xpose.msra.mxu0 %v200_v59  ;;  %v1632_v59 = vld [vmem:[#allocation2 + $0x2b8] sm:$0xff] }
  0x8b   :  { %279 = vmatprep.subr.bf16.mxu0 %v207_v3  ;;  %2004 = vst [vmem:[#allocation48_spill] sm:$0xff] %v1632_v59  ;;  %v1634_v3 = vld [vmem:[#allocation2 + $0x2e8] sm:$0xff] }
  0x8c   :  { %2005 = vst [vmem:[#allocation49_spill] sm:$0xff] %v1634_v3  ;;  %v219_v53 = vpack.c.bf16 %v1634_v3, %v1632_v59  ;;  %v1658_v3 = vld [vmem:[#allocation2 + $0x20] sm:$0xff]  ;;  %v1660_v59 = vld [vmem:[#allocation2 + $0x50] sm:$0xff] }
  0x8d   :  { %2010 = vst [vmem:[#allocation54_spill] sm:$0xff] %v1658_v3  ;;  %2011 = vst [vmem:[#allocation55_spill] sm:$0xff] %v1660_v59  ;;  %v178_v46 = vpack.c.bf16 %v1660_v59, %v1658_v3 }
  0x92   :  { %280 = vmatpush1.bf16.xpose.msra.mxu0 %v206_v31  ;;  %v1642_v31 = vld [vmem:[#allocation2 + $0x2e0] sm:$0xff] }
  0x93   :  { %281 = vmatprep.subr.bf16.mxu0 %v213_v32  ;;  %2007 = vst [vmem:[#allocation51_spill] sm:$0xff] %v1642_v31  ;;  %v1644_v32 = vld [vmem:[#allocation2 + $0x28] sm:$0xff]  ;;  %v218_v17 = vpack.c.bf16 %v1642_v31, %v1640_v8 }
  0x94   :  { %2008 = vst [vmem:[#allocation52_spill] sm:$0xff] %v1644_v32  ;;  %v179_v7 = vpack.c.bf16 %v1646_v18, %v1644_v32  ;;  %v53_v31 = vld [vmem:[%s1922_s0 + $0x28] sm:$0xff]  ;;  %v1670_v32 = vld [vmem:[#allocation2 + $0xb8] sm:$0xff] }
  0x95   :  { %v1668_v18 = vld [vmem:[#allocation2 + $0x88] sm:$0xff]  ;;  %2013 = vst [vmem:[#allocation57_spill] sm:$0xff] %v1670_v32 }
  0x96   :  { %2012 = vst [vmem:[#allocation56_spill] sm:$0xff] %v1668_v18  ;;  %v185_v41 = vpack.c.bf16 %v1670_v32, %v1668_v18  ;;  %v1696_v32 = vld [vmem:[#allocation2 + $0x110] sm:$0xff]  ;;  %v1700_v18 = vld [vmem:[#allocation2 + $0x178] sm:$0xff] }
  0x97   :  { %2019 = vst [vmem:[#allocation63_spill] sm:$0xff] %v1696_v32  ;;  %2021 = vst [vmem:[#allocation65_spill] sm:$0xff] %v1700_v18 }
  0x9a   :  { %282 = vmatpush1.bf16.xpose.msra.mxu0 %v212_v58  ;;  %v50_v58 = vld [vmem:[%s1922_s0 + $0x10] sm:$0xff] }
  0x9b   :  { %283 = vmatprep.subr.bf16.mxu0 %v219_v53  ;;  %v56_v53 = vld [vmem:[%s1922_s0 + $0x40] sm:$0xff] }
  0x9c   :  { %v1672_v8 = vpack.c.bf16 %v56_v53, %v50_v58  ;;  %v1686_v58 = vld [vmem:[#allocation2 + $0xe8] sm:$0xff]  ;;  %v1688_v53 = vld [vmem:[#allocation2 + $0x118] sm:$0xff] }
  0x9d   :  { %2016 = vst [vmem:[#allocation60_spill] sm:$0xff] %v1686_v58  ;;  %2017 = vst [vmem:[#allocation61_spill] sm:$0xff] %v1688_v53 }
  0xa2   :  { %284 = vmatpush1.bf16.xpose.msra.mxu0 %v218_v17  ;;  %v59_v17 = vld [vmem:[%s1922_s0 + $0x58] sm:$0xff] }
  0xa3   :  { %310 = vmatprep.subr.bf16.mxu0 %v179_v7  ;;  %v1676_v7 = vpack.c.bf16 %v59_v17, %v53_v31  ;;  %v184_v31 = vpack.c.bf16 %v1684_v52, %v1682_v40  ;;  %v191_v17 = vpack.c.bf16 %v1688_v53, %v1686_v58  ;;  %v1706_v52 = vld [vmem:[#allocation2 + $0x140] sm:$0xff]  ;;  %v136_v53 = vld [vmem:[#allocation2 + $0x1d8] sm:$0xff] }
  0xa4   :  { %2022 = vst [vmem:[#allocation66_spill] sm:$0xff] %v1706_v52 }
  0xa9   :  { %302 = vmatmul.mubr.bf16.vlgmr.msra.gmra.mrb[0].mxu0 %v1672_v8 }
  0xaa   :  { %311 = vmatpush1.bf16.xpose.msra.mxu0 %v178_v46  ;;  %342 = vmatprep.mubr.bf16.mxu0 %v1676_v7  ;;  %v1694_v46 = vld [vmem:[#allocation2 + $0xe0] sm:$0xff] }
  0xab   :  { %312 = vmatprep.subr.bf16.mxu0 %v185_v41  ;;  %2018 = vst [vmem:[#allocation62_spill] sm:$0xff] %v1694_v46  ;;  %v1698_v41 = vld [vmem:[#allocation2 + $0x148] sm:$0xff]  ;;  %v190_v59 = vpack.c.bf16 %v1696_v32, %v1694_v46  ;;  %v1714_v32 = vld [vmem:[#allocation2 + $0x1d0] sm:$0xff] }
  0xac   :  { %2020 = vst [vmem:[#allocation64_spill] sm:$0xff] %v1698_v41  ;;  %v197_v3 = vpack.c.bf16 %v1700_v18, %v1698_v41  ;;  %2025 = vst [vmem:[#allocation69_spill] sm:$0xff] %v1714_v32  ;;  %v142_v46 = vld [vmem:[#allocation2 + $0x208] sm:$0xff]  ;;  %v148_v18 = vld [vmem:[#allocation2 + $0x238] sm:$0xff] }
  0xad   :  { %v141_v41 = vld [vmem:[#allocation2 + $0x200] sm:$0xff] }
  0xb2   :  { %313 = vmatpush1.bf16.xpose.msra.mxu0 %v184_v31  ;;  %v1708_v31 = vld [vmem:[#allocation2 + $0x170] sm:$0xff] }
  0xb3   :  { %314 = vmatprep.subr.bf16.mxu0 %v191_v17  ;;  %2023 = vst [vmem:[#allocation67_spill] sm:$0xff] %v1708_v31  ;;  %v130_v17 = vld [vmem:[#allocation2 + $0x1a8] sm:$0xff]  ;;  %v196_v58 = vpack.c.bf16 %v1708_v31, %v1706_v52  ;;  %v208_v31 = vpack.c.bf16 %v147_v47, %v141_v41  ;;  %v172_v52 = vld [vmem:[#allocation2 + $0x2f8] sm:$0xff]  ;;  %v66_v47 = vlaneseq  ;;  %v1727_v41 = vld [vmem:[#allocation7] sm:$0x1] }
  0xb4   :  { %v203_v40 = vpack.c.bf16 %v136_v53, %v130_v17  ;;  %v215_v53 = vpack.c.bf16 %v160_v34, %v154_v26  ;;  %v166_v17 = vld [vmem:[#allocation2 + $0x2c8] sm:$0xff]  ;;  %v58_v26 = vld [vmem:[%s1922_s0 + $0x50] sm:$0xff] }
  0xb5   :  { %v221_v33 = vpack.c.bf16 %v172_v52, %v166_v17  ;;  %v224_v52 = vshrl.u32 %v66_v47, 7 }
  0xba   :  { %315 = vmatpush1.bf16.xpose.msra.mxu0 %v190_v59  ;;  %v202_v59 = vpack.c.bf16 %v1714_v32, %v1712_v35  ;;  %v165_v32 = vld [vmem:[#allocation2 + $0x2c0] sm:$0xff] }
  0xbb   :  { %316 = vmatprep.subr.bf16.mxu0 %v197_v3  ;;  %v209_v3 = vpack.c.bf16 %v148_v18, %v142_v46  ;;  %v171_v18 = vld [vmem:[#allocation2 + $0x2f0] sm:$0xff] }
  0xbc   :  { %v220_v46 = vpack.c.bf16 %v171_v18, %v165_v32 }
  0xc2   :  { %317 = vmatpush1.bf16.xpose.msra.mxu0 %v196_v58  ;;  %v159_v58 = vld [vmem:[#allocation2 + $0x290] sm:$0xff] }
  0xc3   :  { %318 = vmatprep.subr.bf16.mxu0 %v203_v40  ;;  %v153_v40 = vld [vmem:[#allocation2 + $0x260] sm:$0xff] }
  0xc4   :  { %v214_v25 = vpack.c.bf16 %v159_v58, %v153_v40 }
  0xca   :  { %319 = vmatpush1.bf16.xpose.msra.mxu0 %v202_v59  ;;  %v52_v59 = vld [vmem:[%s1922_s0 + $0x20] sm:$0xff] }
  0xcb   :  { %320 = vmatprep.subr.bf16.mxu0 %v209_v3  ;;  %v1724_v34 = vpack.c.bf16 %v58_v26, %v52_v59  ;;  %v1357_v3 = vmov -1e+30  }
  0xd2   :  { %321 = vmatpush1.bf16.xpose.msra.mxu0 %v208_v31 }
  0xd3   :  { %322 = vmatprep.subr.bf16.mxu0 %v215_v53 }
  0xda   :  { %323 = vmatpush1.bf16.xpose.msra.mxu0 %v214_v25  ;;  %v225_v25 = vsub.s32 0, %v224_v52 }
  0xdb   :  { %324 = vmatprep.subr.bf16.mxu0 %v221_v33  ;;  %v67_v33 = vand.u32 127, %v66_v47 }
  0xdc   :  { %v226_v32 = vrot.slane %v1727_v41, %v225_v25 }
  0xdd   :  { %vm68_vm0 = vcmp.lt.s32.totalorder %v67_v33, 10 }
  0xde   :  { %v69_v53 = vsel %vm68_vm0, 0.0, %v1357_v3 }
  0xe2   :  { %325 = vmatpush1.bf16.xpose.msra.mxu0 %v220_v46 }
  0xe9   :  { %343 = vmatmul.mubr.bf16.vlgmr.msra.gmra.mrb[0].mxu0 %v1724_v34 }
 0x1bc   :  { %v344_v31 = vpop.f32.mrb[0].mxu0 }
 0x1bd   :  { %v1168_v40 = vadd.f32 %v344_v31, %v226_v32  ;;  %v346_v58 = vpop.f32.mrb[1].mxu0 }
 0x1be   :  { %v347_v17 = vpop.f32.mrb[2].mxu0 }
 0x1bf   :  { %385 = vst [vmem:[#allocation6] sm:$0xff] %v1168_v40  ;;  %v1169_v18 = vadd.f32 %v347_v17, %v226_v32  ;;  %v349_v46 = vpop.f32.mrb[3].mxu0  ;;  %v351_v59 = vadd.f32 %v1168_v40, %v69_v53 }
 0x1c1   :  { %386 = vst [vmem:[#allocation6 + $0x8] sm:$0xff] %v1169_v18  ;;  %353 = vmax.xlane.f32.xlu0 %v351_v59  ;;  %v352_v26 = vadd.f32 %v1169_v18, %v69_v53 }
 0x1c5   :  { %355 = vmax.xlane.f32.xlu0 %v352_v26 }
 0x24e   :  { %v354_v47 = vpop.xlane.xlu0 %353 }
 0x24f   :  { %v357_v52 = vsub.f32 %v351_v59, %v354_v47 }
 0x251   :  { %v359_v35 = vmul.f32 1.442695, %v357_v52 }
 0x252   :  { %v356_v16 = vpop.xlane.xlu0 %355 }
 0x253   :  { %1187 = vpow2.f32 %v359_v35  ;;  %v358_v25 = vsub.f32 %v352_v26, %v356_v16 }
 0x255   :  { %v361_v33 = vmul.f32 1.442695, %v358_v25 }
 0x257   :  { %1189 = vpow2.f32 %v361_v33 }
 0x25d   :  { %v1188_v3 = vpop.eup %1187 }
 0x25e   :  { %363 = vadd.xlane.f32.xlu1 %v1188_v3 }
 0x261   :  { %v1190_v31 = vpop.eup %1189 }
 0x262   :  { %365 = vadd.xlane.f32.xlu1 %v1190_v31 }
 0x2eb   :  { %v364_v58 = vpop.xlane.xlu1 %363 }
 0x2ec   :  { %1191 = vrcp.f32 %v364_v58 }
 0x2ed   :  { %1193 = vlog2.f32 %v364_v58 }
 0x2ef   :  { %v366_v32 = vpop.xlane.xlu1 %365 }
 0x2f0   :  { %1195 = vrcp.f32 %v366_v32 }
 0x2f1   :  { %1197 = vlog2.f32 %v366_v32 }
 0x2f6   :  { %v1192_v53 = vpop.eup %1191 }
 0x2f7   :  { %v1194_v40 = vpop.eup %1193  ;;  %v369_v46 = vmul.f32 %v1192_v53, %v1188_v3 }
 0x2f8   :  { %v372_v17 = vmul.f32 0.6931472, %v1194_v40 }
 0x2f9   :  { %v398_v14 = vsub.f32 0.0, %v369_v46 }
 0x2fa   :  { %v1196_v18 = vpop.eup %1195  ;;  %v375_v59 = vsub.f32 %v357_v52, %v372_v17 }
 0x2fb   :  { %v1198_v35 = vpop.eup %1197  ;;  %v370_v47 = vmul.f32 %v1196_v18, %v1190_v31 }
 0x2fc   :  { %v374_v16 = vmul.f32 0.6931472, %v1198_v35  ;;  %v377_v26 = vmul.f32 %v375_v59, %v369_v46 }
 0x2fd   :  { %v399_v62 = vsub.f32 0.0, %v370_v47 }
 0x2fe   :  { %379 = vadd.xlane.f32.xlu0 %v377_v26  ;;  %v376_v33 = vsub.f32 %v358_v25, %v374_v16 }
 0x300   :  { %v378_v22 = vmul.f32 %v376_v33, %v370_v47 }
 0x302   :  { %381 = vadd.xlane.f32.xlu1 %v378_v22 }
 0x38b   :  { %v380_v58 = vpop.xlane.xlu0 %379 }
 0x38c   :  { %v383_v19 = vsub.f32 0.0, %v380_v58 }
 0x38e   :  { %v400_v32 = vadd.f32 %v383_v19, %v375_v59  ;;  %v387_v3 = vmul.f32 0.125, %v383_v19 }
 0x38f   :  { %v382_v63 = vpop.xlane.xlu1 %381 }
 0x390   :  { %v384_v40 = vsub.f32 0.0, %v382_v63  ;;  %v402_v17 = vmul.f32 %v400_v32, %v398_v14 }
 0x392   :  { %v388_v52 = vmul.f32 0.0, %v384_v40  ;;  %v401_v53 = vadd.f32 %v384_v40, %v376_v33  ;;  %v404_v25 = vmul.f32 0.125, %v402_v17 }
 0x394   :  { %v389_v35 = vadd.f32 %v388_v52, %v387_v3  ;;  %v403_v26 = vmul.f32 %v401_v53, %v399_v62 }
 0x396   :  { %v390_v31 = vrot.slane %v389_v35, 4  ;;  %v405_v18 = vmul.f32 0.0, %v403_v26 }
 0x398   :  { %v391_v22 = vadd.f32 %v390_v31, %v389_v35  ;;  %v406_v16 = vpack.c.bf16 %v405_v18, %v404_v25  ;;  %v787_v13 = vadd.f32 %v405_v18, %v404_v25 }
 0x39a   :  { %v392_v15 = vrot.slane %v391_v22, 2  ;;  %v788_v57 = vrot.slane %v787_v13, 4  ;;  %407 = vxpose.xlu0.c.b16.start.end [1/1] (short) %v406_v16, 128 }
 0x39c   :  { %v393_v59 = vadd.f32 %v392_v15, %v391_v22  ;;  %v789_v58 = vadd.f32 %v788_v57, %v787_v13  ;;  %v2026_v15 = vmov 0  }
 0x39e   :  { %v394_v46 = vrot.slane %v393_v59, 1  ;;  %v790_v63 = vrot.slane %v789_v58, 2 }
 0x3a0   :  { %v395_v19 = vadd.f32 %v394_v46, %v393_v59  ;;  %v791_v47 = vadd.f32 %v790_v63, %v789_v58 }
 0x3a2   :  { %397 = vst.msk [vmem:[#allocation9] sm:$0x1] %vm396_vm1, %v395_v19  ;;  %v792_v14 = vrot.slane %v791_v47, 1 }
 0x3a4   :  { %v793_v33 = vadd.f32 %v792_v14, %v791_v47 }
 0x3a6   :  { %v1082_v62 = vmul.f32 0.001, %v793_v33 }
 0x3a8   :  { %v1083_v32 = vsub.f32 %v1727_v41, %v1082_v62 }
 0x3aa   :  { %1084 = vst [vmem:[#allocation7] sm:$0x1] %v1083_v32 }
 0x400   :  { %v415_v40 = vpop.trf.xlu0 }
 0x401   :  { %1144 = vmatmul.mubr.msk.bf16.vlgmr.msra.gmra.mrb[0].mxu1 %vm423_vm2, %v415_v40 }
 0x402   :  { %562 = vmatpush1.bf16.msra.mxu1 %v1672_v8  ;;  %490 = vmatprep.mubr.bf16.mxu1 %v2026_v15 }
 0x403   :  { %674 = vmatprep.subr.bf16.mxu1 %v1676_v7 }
 0x404   :  { %v416_v57 = vpop.trf.xlu0 }
 0x408   :  { %v417_v13 = vpop.trf.xlu0 }
 0x409   :  { %1145 = vmatmul.mubr.msk.bf16.gmra.mrb[4].mxu1 %vm423_vm2, %v416_v57 }
 0x40a   :  { %500 = vmatprep.mubr.bf16.mxu1 %v2026_v15 }
 0x40c   :  { %v418_v41 = vpop.trf.xlu0 }
 0x410   :  { %v419_v8 = vpop.trf.xlu0 }
 0x411   :  { %1146 = vmatmul.mubr.msk.bf16.gmra.mrb[8].mxu1 %vm423_vm2, %v417_v13 }
 0x412   :  { %510 = vmatprep.mubr.bf16.mxu1 %v2026_v15 }
 0x414   :  { %v420_v7 = vpop.trf.xlu0 }
 0x418   :  { %v421_v3 = vpop.trf.xlu0 }
 0x419   :  { %1147 = vmatmul.mubr.msk.bf16.gmra.mrb[12].mxu1 %vm423_vm2, %v418_v41 }
 0x41a   :  { %520 = vmatprep.mubr.bf16.mxu1 %v2026_v15 }
 0x41c   :  { %v422_v52 = vpop.trf.xlu0 }
 0x421   :  { %1148 = vmatmul.mubr.msk.bf16.gmra.mrb[16].mxu1 %vm423_vm2, %v419_v8 }
 0x422   :  { %530 = vmatprep.mubr.bf16.mxu1 %v2026_v15 }
 0x429   :  { %1149 = vmatmul.mubr.msk.bf16.gmra.mrb[20].mxu1 %vm423_vm2, %v420_v7 }
 0x42a   :  { %540 = vmatprep.mubr.bf16.mxu1 %v2026_v15 }
 0x431   :  { %1150 = vmatmul.mubr.msk.bf16.gmra.mrb[24].mxu1 %vm423_vm2, %v421_v3 }
 0x432   :  { %550 = vmatprep.mubr.bf16.mxu1 %v2026_v15 }
 0x439   :  { %1151 = vmatmul.mubr.msk.bf16.gmra.mrb[28].mxu1 %vm423_vm2, %v422_v52 }
 0x43a   :  { %593 = vmatprep.mubr.bf16.mxu1 %v2026_v15 }
 0x441   :  { %1152 = vmatmul.mubr.msk.bf16.vlgmr.msra.gmra.mrb[32].mxu1 %vm423_vm2, %v415_v40 }
 0x442   :  { %675 = vmatpush1.bf16.msra.mxu1 %v1724_v34  ;;  %603 = vmatprep.mubr.bf16.mxu1 %v2026_v15 }
 0x449   :  { %1153 = vmatmul.mubr.msk.bf16.gmra.mrb[36].mxu1 %vm423_vm2, %v416_v57 }
 0x44a   :  { %613 = vmatprep.mubr.bf16.mxu1 %v2026_v15 }
 0x451   :  { %1154 = vmatmul.mubr.msk.bf16.gmra.mrb[40].mxu1 %vm423_vm2, %v417_v13 }
 0x452   :  { %623 = vmatprep.mubr.bf16.mxu1 %v2026_v15 }
 0x459   :  { %1155 = vmatmul.mubr.msk.bf16.gmra.mrb[44].mxu1 %vm423_vm2, %v418_v41 }
 0x45a   :  { %633 = vmatprep.mubr.bf16.mxu1 %v2026_v15 }
 0x461   :  { %1156 = vmatmul.mubr.msk.bf16.gmra.mrb[48].mxu1 %vm423_vm2, %v419_v8 }
 0x462   :  { %643 = vmatprep.mubr.bf16.mxu1 %v2026_v15 }
 0x469   :  { %1157 = vmatmul.mubr.msk.bf16.gmra.mrb[52].mxu1 %vm423_vm2, %v420_v7 }
 0x46a   :  { %653 = vmatprep.mubr.bf16.mxu1 %v2026_v15 }
 0x471   :  { %1158 = vmatmul.mubr.msk.bf16.gmra.mrb[56].mxu1 %vm423_vm2, %v421_v3 }
 0x472   :  { %663 = vmatprep.mubr.bf16.mxu1 %v2026_v15 }
 0x479   :  { %1159 = vmatmul.mubr.msk.bf16.gmra.mrb[60].mxu1 %vm423_vm2, %v422_v52 }
 0x47a   :  { %706 = vmatprep.mubr.bf16.mxu1 %v2026_v15 }
 0x481   :  { %1160 = vmatmul.mubr.msk.bf16.vlgmr.msra.gmra.mrb[64].mxu1 %vm423_vm2, %v415_v40 }
 0x482   :  { %716 = vmatprep.mubr.bf16.mxu1 %v2026_v15 }
 0x489   :  { %1161 = vmatmul.mubr.msk.bf16.gmra.mrb[68].mxu1 %vm423_vm2, %v416_v57 }
 0x48a   :  { %726 = vmatprep.mubr.bf16.mxu1 %v2026_v15 }
 0x491   :  { %1162 = vmatmul.mubr.msk.bf16.gmra.mrb[72].mxu1 %vm423_vm2, %v417_v13 }
 0x492   :  { %736 = vmatprep.mubr.bf16.mxu1 %v2026_v15 }
 0x499   :  { %1163 = vmatmul.mubr.msk.bf16.gmra.mrb[76].mxu1 %vm423_vm2, %v418_v41 }
 0x49a   :  { %746 = vmatprep.mubr.bf16.mxu1 %v2026_v15 }
 0x4a1   :  { %1164 = vmatmul.mubr.msk.bf16.gmra.mrb[80].mxu1 %vm423_vm2, %v419_v8 }
 0x4a2   :  { %756 = vmatprep.mubr.bf16.mxu1 %v2026_v15 }
 0x4a9   :  { %1165 = vmatmul.mubr.msk.bf16.gmra.mrb[84].mxu1 %vm423_vm2, %v420_v7 }
 0x4aa   :  { %766 = vmatprep.mubr.bf16.mxu1 %v2026_v15 }
 0x4b1   :  { %1166 = vmatmul.mubr.msk.bf16.gmra.mrb[88].mxu1 %vm423_vm2, %v421_v3 }
 0x4b2   :  { %776 = vmatprep.mubr.bf16.mxu1 %v2026_v15 }
 0x4b9   :  { %1167 = vmatmul.mubr.msk.bf16.gmra.mrb[92].mxu1 %vm423_vm2, %v422_v52 }
 0x4d4   :  { %v482_v34 = vpop.f32.mrb[0].mxu1 }
 0x4d5   :  { %v794_v53 = vmul.f32 0.001, %v482_v34  ;;  %v484_v17 = vpop.f32.mrb[1].mxu1 }
 0x4d6   :  { %v795_v35 = vmul.f32 0.001, %v484_v17  ;;  %v486_v26 = vpop.f32.mrb[2].mxu1 }
 0x4d7   :  { %v890_v31 = vsub.f32 %v1440_v2, %v794_v53  ;;  %v800_v25 = vmul.f32 0.001, %v486_v26  ;;  %v488_v18 = vpop.f32.mrb[3].mxu1 }
 0x4d8   :  { %v891_v22 = vsub.f32 %v1436_v0, %v795_v35  ;;  %v801_v16 = vmul.f32 0.001, %v488_v18 }
 0x4d9   :  { %986 = vst [vmem:[#allocation2] sm:$0xff] %v890_v31  ;;  %v896_v59 = vsub.f32 %v1444_v4, %v800_v25 }
 0x4da   :  { %987 = vst [vmem:[#allocation2 + $0x8] sm:$0xff] %v891_v22  ;;  %v897_v58 = vsub.f32 %v1438_v1, %v801_v16 }
 0x4db   :  { %992 = vst [vmem:[#allocation2 + $0x30] sm:$0xff] %v896_v59 }
 0x4dc   :  { %993 = vst [vmem:[#allocation2 + $0x38] sm:$0xff] %v897_v58  ;;  %v492_v46 = vpop.f32.mrb[4].mxu1 }
 0x4dd   :  { %v806_v63 = vmul.f32 0.001, %v492_v46  ;;  %v494_v19 = vpop.f32.mrb[5].mxu1 }
 0x4de   :  { %v807_v47 = vmul.f32 0.001, %v494_v19  ;;  %v496_v14 = vpop.f32.mrb[6].mxu1 }
 0x4df   :  { %v902_v2 = vsub.f32 %v1454_v9, %v806_v63  ;;  %v812_v33 = vmul.f32 0.001, %v496_v14  ;;  %v498_v62 = vpop.f32.mrb[7].mxu1 }
 0x4e0   :  { %v903_v0 = vsub.f32 %v1446_v5, %v807_v47  ;;  %v813_v32 = vmul.f32 0.001, %v498_v62 }
 0x4e1   :  { %998 = vst [vmem:[#allocation2 + $0x60] sm:$0xff] %v902_v2  ;;  %v908_v4 = vsub.f32 %v1456_v10, %v812_v33 }
 0x4e2   :  { %999 = vst [vmem:[#allocation2 + $0x68] sm:$0xff] %v903_v0  ;;  %v909_v1 = vsub.f32 %v1448_v6, %v813_v32 }
 0x4e3   :  { %1004 = vst [vmem:[#allocation2 + $0x90] sm:$0xff] %v908_v4 }
 0x4e4   :  { %1005 = vst [vmem:[#allocation2 + $0x98] sm:$0xff] %v909_v1  ;;  %v502_v40 = vpop.f32.mrb[8].mxu1 }
 0x4e5   :  { %v818_v15 = vmul.f32 0.001, %v502_v40  ;;  %v504_v57 = vpop.f32.mrb[9].mxu1 }
 0x4e6   :  { %v819_v13 = vmul.f32 0.001, %v504_v57  ;;  %v506_v41 = vpop.f32.mrb[10].mxu1 }
 0x4e7   :  { %v914_v9 = vsub.f32 %v1478_v20, %v818_v15  ;;  %v824_v8 = vmul.f32 0.001, %v506_v41  ;;  %v508_v7 = vpop.f32.mrb[11].mxu1 }
 0x4e8   :  { %v915_v5 = vsub.f32 %v1458_v11, %v819_v13  ;;  %v825_v3 = vmul.f32 0.001, %v508_v7 }
 0x4e9   :  { %1010 = vst [vmem:[#allocation2 + $0xc0] sm:$0xff] %v914_v9  ;;  %v920_v10 = vsub.f32 %v1480_v21, %v824_v8 }
 0x4ea   :  { %1011 = vst [vmem:[#allocation2 + $0xc8] sm:$0xff] %v915_v5  ;;  %v921_v6 = vsub.f32 %v1460_v12, %v825_v3 }
 0x4eb   :  { %1016 = vst [vmem:[#allocation2 + $0xf0] sm:$0xff] %v920_v10 }
 0x4ec   :  { %1017 = vst [vmem:[#allocation2 + $0xf8] sm:$0xff] %v921_v6  ;;  %v512_v52 = vpop.f32.mrb[12].mxu1 }
 0x4ed   :  { %v830_v34 = vmul.f32 0.001, %v512_v52  ;;  %v514_v53 = vpop.f32.mrb[13].mxu1 }
 0x4ee   :  { %v831_v17 = vmul.f32 0.001, %v514_v53  ;;  %v516_v35 = vpop.f32.mrb[14].mxu1 }
 0x4ef   :  { %v926_v20 = vsub.f32 %v1490_v27, %v830_v34  ;;  %v836_v26 = vmul.f32 0.001, %v516_v35  ;;  %v518_v31 = vpop.f32.mrb[15].mxu1 }
 0x4f0   :  { %v927_v11 = vsub.f32 %v1482_v23, %v831_v17  ;;  %v837_v25 = vmul.f32 0.001, %v518_v31 }
 0x4f1   :  { %1022 = vst [vmem:[#allocation2 + $0x120] sm:$0xff] %v926_v20  ;;  %v932_v21 = vsub.f32 %v1492_v28, %v836_v26 }
 0x4f2   :  { %1023 = vst [vmem:[#allocation2 + $0x128] sm:$0xff] %v927_v11  ;;  %v933_v12 = vsub.f32 %v1484_v24, %v837_v25 }
 0x4f3   :  { %1028 = vst [vmem:[#allocation2 + $0x150] sm:$0xff] %v932_v21 }
 0x4f4   :  { %1029 = vst [vmem:[#allocation2 + $0x158] sm:$0xff] %v933_v12  ;;  %v522_v18 = vpop.f32.mrb[16].mxu1  ;;  %v2027_v12 = vld [vmem:[#allocation23_spill] sm:$0xff] }
 0x4f5   :  { %v842_v22 = vmul.f32 0.001, %v522_v18  ;;  %v524_v16 = vpop.f32.mrb[17].mxu1 }
 0x4f6   :  { %v843_v59 = vmul.f32 0.001, %v524_v16  ;;  %v526_v58 = vpop.f32.mrb[18].mxu1 }
 0x4f7   :  { %v938_v27 = vsub.f32 %v1508_v36, %v842_v22  ;;  %v848_v46 = vmul.f32 0.001, %v526_v58  ;;  %v528_v63 = vpop.f32.mrb[19].mxu1 }
 0x4f8   :  { %v939_v23 = vsub.f32 %v1494_v29, %v843_v59  ;;  %v849_v19 = vmul.f32 0.001, %v528_v63 }
 0x4f9   :  { %1034 = vst [vmem:[#allocation2 + $0x180] sm:$0xff] %v938_v27  ;;  %v944_v28 = vsub.f32 %v1510_v37, %v848_v46  ;;  %v2028_v27 = vld [vmem:[#allocation26_spill] sm:$0xff] }
 0x4fa   :  { %1035 = vst [vmem:[#allocation2 + $0x188] sm:$0xff] %v939_v23  ;;  %v945_v24 = vsub.f32 %v1496_v30, %v849_v19  ;;  %v2029_v23 = vld [vmem:[#allocation24_spill] sm:$0xff] }
 0x4fb   :  { %1040 = vst [vmem:[#allocation2 + $0x1b0] sm:$0xff] %v944_v28  ;;  %v2030_v28 = vld [vmem:[#allocation27_spill] sm:$0xff] }
 0x4fc   :  { %1041 = vst [vmem:[#allocation2 + $0x1b8] sm:$0xff] %v945_v24  ;;  %v532_v47 = vpop.f32.mrb[20].mxu1  ;;  %v2031_v24 = vld [vmem:[#allocation25_spill] sm:$0xff] }
 0x4fd   :  { %v854_v14 = vmul.f32 0.001, %v532_v47  ;;  %v534_v2 = vpop.f32.mrb[21].mxu1 }
 0x4fe   :  { %v855_v33 = vmul.f32 0.001, %v534_v2  ;;  %v536_v62 = vpop.f32.mrb[22].mxu1 }
 0x4ff   :  { %v950_v36 = vsub.f32 %v1520_v42, %v854_v14  ;;  %v860_v0 = vmul.f32 0.001, %v536_v62  ;;  %v538_v32 = vpop.f32.mrb[23].mxu1 }
 0x500   :  { %v951_v29 = vsub.f32 %v1512_v38, %v855_v33  ;;  %v861_v4 = vmul.f32 0.001, %v538_v32 }
 0x501   :  { %1046 = vst [vmem:[#allocation2 + $0x1e0] sm:$0xff] %v950_v36  ;;  %v956_v37 = vsub.f32 %v1522_v43, %v860_v0  ;;  %v2032_v0 = vld [vmem:[#allocation30_spill] sm:$0xff] }
 0x502   :  { %1047 = vst [vmem:[#allocation2 + $0x1e8] sm:$0xff] %v951_v29  ;;  %v957_v30 = vsub.f32 %v1514_v39, %v861_v4 }
 0x503   :  { %1052 = vst [vmem:[#allocation2 + $0x210] sm:$0xff] %v956_v37  ;;  %v2033_v37 = vld [vmem:[#allocation28_spill] sm:$0xff] }
 0x504   :  { %1053 = vst [vmem:[#allocation2 + $0x218] sm:$0xff] %v957_v30  ;;  %v542_v1 = vpop.f32.mrb[24].mxu1 }
 0x505   :  { %v866_v40 = vmul.f32 0.001, %v542_v1  ;;  %v544_v15 = vpop.f32.mrb[25].mxu1 }
 0x506   :  { %v867_v57 = vmul.f32 0.001, %v544_v15  ;;  %v546_v13 = vpop.f32.mrb[26].mxu1 }
 0x507   :  { %v962_v42 = vsub.f32 %v1532_v48, %v866_v40  ;;  %v872_v41 = vmul.f32 0.001, %v546_v13  ;;  %v548_v9 = vpop.f32.mrb[27].mxu1  ;;  %v2034_v40 = vld [vmem:[#allocation31_spill] sm:$0xff] }
 0x508   :  { %v963_v38 = vsub.f32 %v1524_v44, %v867_v57  ;;  %v873_v8 = vmul.f32 0.001, %v548_v9  ;;  %v2035_v57 = vld [vmem:[#allocation29_spill] sm:$0xff] }
 0x509   :  { %1058 = vst [vmem:[#allocation2 + $0x240] sm:$0xff] %v962_v42  ;;  %v968_v43 = vsub.f32 %v1534_v49, %v872_v41 }
 0x50a   :  { %1059 = vst [vmem:[#allocation2 + $0x248] sm:$0xff] %v963_v38  ;;  %v969_v39 = vsub.f32 %v1526_v45, %v873_v8 }
 0x50b   :  { %1064 = vst [vmem:[#allocation2 + $0x270] sm:$0xff] %v968_v43  ;;  %v2036_v43 = vld [vmem:[#allocation34_spill] sm:$0xff] }
 0x50c   :  { %1065 = vst [vmem:[#allocation2 + $0x278] sm:$0xff] %v969_v39  ;;  %v552_v7 = vpop.f32.mrb[28].mxu1 }
 0x50d   :  { %v878_v5 = vmul.f32 0.001, %v552_v7  ;;  %v554_v3 = vpop.f32.mrb[29].mxu1 }
 0x50e   :  { %v879_v10 = vmul.f32 0.001, %v554_v3  ;;  %v556_v6 = vpop.f32.mrb[30].mxu1  ;;  %v2037_v3 = vld [vmem:[#allocation32_spill] sm:$0xff] }
 0x50f   :  { %v974_v48 = vsub.f32 %v1544_v54, %v878_v5  ;;  %v884_v52 = vmul.f32 0.001, %v556_v6  ;;  %v558_v34 = vpop.f32.mrb[31].mxu1 }
 0x510   :  { %v975_v44 = vsub.f32 %v1536_v50, %v879_v10  ;;  %v885_v53 = vmul.f32 0.001, %v558_v34  ;;  %v2039_v34 = vld [vmem:[#allocation33_spill] sm:$0xff] }
 0x511   :  { %1070 = vst [vmem:[#allocation2 + $0x2a0] sm:$0xff] %v974_v48  ;;  %v980_v49 = vsub.f32 %v1546_v55, %v884_v52  ;;  %v2038_v48 = vld [vmem:[#allocation35_spill] sm:$0xff] }
 0x512   :  { %1071 = vst [vmem:[#allocation2 + $0x2a8] sm:$0xff] %v975_v44  ;;  %v981_v45 = vsub.f32 %v1538_v51, %v885_v53 }
 0x513   :  { %1076 = vst [vmem:[#allocation2 + $0x2d0] sm:$0xff] %v980_v49 }
 0x514   :  { %1077 = vst [vmem:[#allocation2 + $0x2d8] sm:$0xff] %v981_v45  ;;  %v595_v17 = vpop.f32.mrb[32].mxu1 }
 0x515   :  { %v796_v35 = vmul.f32 0.001, %v595_v17  ;;  %v597_v20 = vpop.f32.mrb[33].mxu1 }
 0x516   :  { %v797_v26 = vmul.f32 0.001, %v597_v20  ;;  %v599_v31 = vpop.f32.mrb[34].mxu1  ;;  %v2040_v20 = vld [vmem:[#allocation38_spill] sm:$0xff] }
 0x517   :  { %v892_v54 = vsub.f32 %v1556_v60, %v796_v35  ;;  %v802_v11 = vmul.f32 0.001, %v599_v31  ;;  %v601_v25 = vpop.f32.mrb[35].mxu1 }
 0x518   :  { %v893_v50 = vsub.f32 %v1548_v56, %v797_v26  ;;  %v803_v21 = vmul.f32 0.001, %v601_v25 }
 0x519   :  { %988 = vst [vmem:[#allocation2 + $0x10] sm:$0xff] %v892_v54  ;;  %v898_v55 = vsub.f32 %v1558_v61, %v802_v11  ;;  %v2041_v11 = vld [vmem:[#allocation36_spill] sm:$0xff] }
 0x51a   :  { %989 = vst [vmem:[#allocation2 + $0x18] sm:$0xff] %v893_v50  ;;  %v899_v51 = vsub.f32 %v2027_v12, %v803_v21  ;;  %v2042_v21 = vld [vmem:[#allocation39_spill] sm:$0xff]  ;;  %v2043_v12 = vld [vmem:[#allocation37_spill] sm:$0xff] }
 0x51b   :  { %994 = vst [vmem:[#allocation2 + $0x40] sm:$0xff] %v898_v55 }
 0x51c   :  { %995 = vst [vmem:[#allocation2 + $0x48] sm:$0xff] %v899_v51  ;;  %v605_v18 = vpop.f32.mrb[36].mxu1 }
 0x51d   :  { %v808_v22 = vmul.f32 0.001, %v605_v18  ;;  %v607_v16 = vpop.f32.mrb[37].mxu1 }
 0x51e   :  { %v809_v59 = vmul.f32 0.001, %v607_v16  ;;  %v609_v58 = vpop.f32.mrb[38].mxu1 }
 0x51f   :  { %v904_v60 = vsub.f32 %v2028_v27, %v808_v22  ;;  %v814_v46 = vmul.f32 0.001, %v609_v58  ;;  %v611_v63 = vpop.f32.mrb[39].mxu1  ;;  %v2044_v27 = vld [vmem:[#allocation42_spill] sm:$0xff] }
 0x520   :  { %v905_v56 = vsub.f32 %v2029_v23, %v809_v59  ;;  %v815_v19 = vmul.f32 0.001, %v611_v63  ;;  %v2045_v23 = vld [vmem:[#allocation40_spill] sm:$0xff] }
 0x521   :  { %1000 = vst [vmem:[#allocation2 + $0x70] sm:$0xff] %v904_v60  ;;  %v910_v61 = vsub.f32 %v2030_v28, %v814_v46  ;;  %v2046_v28 = vld [vmem:[#allocation43_spill] sm:$0xff] }
 0x522   :  { %1001 = vst [vmem:[#allocation2 + $0x78] sm:$0xff] %v905_v56  ;;  %v911_v47 = vsub.f32 %v2031_v24, %v815_v19  ;;  %v2047_v24 = vld [vmem:[#allocation41_spill] sm:$0xff] }
 0x523   :  { %1006 = vst [vmem:[#allocation2 + $0xa0] sm:$0xff] %v910_v61 }
 0x524   :  { %1007 = vst [vmem:[#allocation2 + $0xa8] sm:$0xff] %v911_v47  ;;  %v615_v14 = vpop.f32.mrb[40].mxu1 }
 0x525   :  { %v820_v2 = vmul.f32 0.001, %v615_v14  ;;  %v617_v33 = vpop.f32.mrb[41].mxu1 }
 0x526   :  { %v821_v62 = vmul.f32 0.001, %v617_v33  ;;  %v619_v36 = vpop.f32.mrb[42].mxu1 }
 0x527   :  { %v916_v32 = vsub.f32 %v2032_v0, %v820_v2  ;;  %v826_v29 = vmul.f32 0.001, %v619_v36  ;;  %v621_v4 = vpop.f32.mrb[43].mxu1  ;;  %v2048_v0 = vld [vmem:[#allocation46_spill] sm:$0xff] }
 0x528   :  { %v917_v30 = vsub.f32 %v2033_v37, %v821_v62  ;;  %v827_v1 = vmul.f32 0.001, %v621_v4  ;;  %v2049_v37 = vld [vmem:[#allocation44_spill] sm:$0xff] }
 0x529   :  { %1012 = vst [vmem:[#allocation2 + $0xd0] sm:$0xff] %v916_v32  ;;  %v922_v15 = vsub.f32 %v2034_v40, %v826_v29  ;;  %v2050_v40 = vld [vmem:[#allocation47_spill] sm:$0xff] }
 0x52a   :  { %1013 = vst [vmem:[#allocation2 + $0xd8] sm:$0xff] %v917_v30  ;;  %v923_v13 = vsub.f32 %v2035_v57, %v827_v1  ;;  %v2051_v57 = vld [vmem:[#allocation45_spill] sm:$0xff] }
 0x52b   :  { %1018 = vst [vmem:[#allocation2 + $0x100] sm:$0xff] %v922_v15 }
 0x52c   :  { %1019 = vst [vmem:[#allocation2 + $0x108] sm:$0xff] %v923_v13  ;;  %v625_v42 = vpop.f32.mrb[44].mxu1 }
 0x52d   :  { %v832_v41 = vmul.f32 0.001, %v625_v42  ;;  %v627_v9 = vpop.f32.mrb[45].mxu1 }
 0x52e   :  { %v833_v38 = vmul.f32 0.001, %v627_v9  ;;  %v629_v8 = vpop.f32.mrb[46].mxu1 }
 0x52f   :  { %v928_v39 = vsub.f32 %v2036_v43, %v832_v41  ;;  %v838_v7 = vmul.f32 0.001, %v629_v8  ;;  %v631_v5 = vpop.f32.mrb[47].mxu1  ;;  %v2052_v43 = vld [vmem:[#allocation50_spill] sm:$0xff] }
 0x530   :  { %v929_v10 = vsub.f32 %v2037_v3, %v833_v38  ;;  %v839_v6 = vmul.f32 0.001, %v631_v5  ;;  %v2053_v3 = vld [vmem:[#allocation48_spill] sm:$0xff] }
 0x531   :  { %1024 = vst [vmem:[#allocation2 + $0x130] sm:$0xff] %v928_v39  ;;  %v934_v52 = vsub.f32 %v2038_v48, %v838_v7  ;;  %v2054_v48 = vld [vmem:[#allocation51_spill] sm:$0xff] }
 0x532   :  { %1025 = vst [vmem:[#allocation2 + $0x138] sm:$0xff] %v929_v10  ;;  %v935_v44 = vsub.f32 %v2039_v34, %v839_v6  ;;  %v2055_v34 = vld [vmem:[#allocation49_spill] sm:$0xff] }
 0x533   :  { %1030 = vst [vmem:[#allocation2 + $0x160] sm:$0xff] %v934_v52 }
 0x534   :  { %1031 = vst [vmem:[#allocation2 + $0x168] sm:$0xff] %v935_v44  ;;  %v635_v53 = vpop.f32.mrb[48].mxu1 }
 0x535   :  { %v844_v49 = vmul.f32 0.001, %v635_v53  ;;  %v637_v45 = vpop.f32.mrb[49].mxu1 }
 0x536   :  { %v845_v17 = vmul.f32 0.001, %v637_v45  ;;  %v639_v35 = vpop.f32.mrb[50].mxu1 }
 0x537   :  { %v940_v26 = vsub.f32 %v2040_v20, %v844_v49  ;;  %v850_v31 = vmul.f32 0.001, %v639_v35  ;;  %v641_v54 = vpop.f32.mrb[51].mxu1  ;;  %v2056_v20 = vld [vmem:[#allocation54_spill] sm:$0xff] }
 0x538   :  { %v941_v25 = vsub.f32 %v2041_v11, %v845_v17  ;;  %v851_v50 = vmul.f32 0.001, %v641_v54  ;;  %v2057_v11 = vld [vmem:[#allocation52_spill] sm:$0xff] }
 0x539   :  { %1036 = vst [vmem:[#allocation2 + $0x190] sm:$0xff] %v940_v26  ;;  %v946_v55 = vsub.f32 %v2042_v21, %v850_v31  ;;  %v2058_v21 = vld [vmem:[#allocation55_spill] sm:$0xff] }
 0x53a   :  { %1037 = vst [vmem:[#allocation2 + $0x198] sm:$0xff] %v941_v25  ;;  %v947_v51 = vsub.f32 %v2043_v12, %v851_v50  ;;  %v2059_v12 = vld [vmem:[#allocation53_spill] sm:$0xff] }
 0x53b   :  { %1042 = vst [vmem:[#allocation2 + $0x1c0] sm:$0xff] %v946_v55 }
 0x53c   :  { %1043 = vst [vmem:[#allocation2 + $0x1c8] sm:$0xff] %v947_v51  ;;  %v645_v18 = vpop.f32.mrb[52].mxu1 }
 0x53d   :  { %v856_v22 = vmul.f32 0.001, %v645_v18  ;;  %v647_v16 = vpop.f32.mrb[53].mxu1 }
 0x53e   :  { %v857_v59 = vmul.f32 0.001, %v647_v16  ;;  %v649_v58 = vpop.f32.mrb[54].mxu1 }
 0x53f   :  { %v952_v60 = vsub.f32 %v2044_v27, %v856_v22  ;;  %v862_v46 = vmul.f32 0.001, %v649_v58  ;;  %v651_v63 = vpop.f32.mrb[55].mxu1  ;;  %v2060_v27 = vld [vmem:[#allocation58_spill] sm:$0xff] }
 0x540   :  { %v953_v56 = vsub.f32 %v2045_v23, %v857_v59  ;;  %v863_v19 = vmul.f32 0.001, %v651_v63  ;;  %v2061_v23 = vld [vmem:[#allocation56_spill] sm:$0xff] }
 0x541   :  { %1048 = vst [vmem:[#allocation2 + $0x1f0] sm:$0xff] %v952_v60  ;;  %v958_v61 = vsub.f32 %v2046_v28, %v862_v46  ;;  %v2062_v28 = vld [vmem:[#allocation59_spill] sm:$0xff] }
 0x542   :  { %1049 = vst [vmem:[#allocation2 + $0x1f8] sm:$0xff] %v953_v56  ;;  %v959_v47 = vsub.f32 %v2047_v24, %v863_v19  ;;  %v2063_v24 = vld [vmem:[#allocation57_spill] sm:$0xff] }
 0x543   :  { %1054 = vst [vmem:[#allocation2 + $0x220] sm:$0xff] %v958_v61 }
 0x544   :  { %1055 = vst [vmem:[#allocation2 + $0x228] sm:$0xff] %v959_v47  ;;  %v655_v14 = vpop.f32.mrb[56].mxu1 }
 0x545   :  { %v868_v2 = vmul.f32 0.001, %v655_v14  ;;  %v657_v33 = vpop.f32.mrb[57].mxu1 }
 0x546   :  { %v869_v62 = vmul.f32 0.001, %v657_v33  ;;  %v659_v36 = vpop.f32.mrb[58].mxu1 }
 0x547   :  { %v964_v32 = vsub.f32 %v2048_v0, %v868_v2  ;;  %v874_v29 = vmul.f32 0.001, %v659_v36  ;;  %v661_v4 = vpop.f32.mrb[59].mxu1  ;;  %v2064_v0 = vld [vmem:[#allocation62_spill] sm:$0xff] }
 0x548   :  { %v965_v30 = vsub.f32 %v2049_v37, %v869_v62  ;;  %v875_v1 = vmul.f32 0.001, %v661_v4  ;;  %v2065_v37 = vld [vmem:[#allocation60_spill] sm:$0xff] }
 0x549   :  { %1060 = vst [vmem:[#allocation2 + $0x250] sm:$0xff] %v964_v32  ;;  %v970_v15 = vsub.f32 %v2050_v40, %v874_v29  ;;  %v2066_v40 = vld [vmem:[#allocation63_spill] sm:$0xff] }
 0x54a   :  { %1061 = vst [vmem:[#allocation2 + $0x258] sm:$0xff] %v965_v30  ;;  %v971_v13 = vsub.f32 %v2051_v57, %v875_v1  ;;  %v2067_v57 = vld [vmem:[#allocation61_spill] sm:$0xff] }
 0x54b   :  { %1066 = vst [vmem:[#allocation2 + $0x280] sm:$0xff] %v970_v15 }
 0x54c   :  { %1067 = vst [vmem:[#allocation2 + $0x288] sm:$0xff] %v971_v13  ;;  %v665_v42 = vpop.f32.mrb[60].mxu1 }
 0x54d   :  { %v880_v41 = vmul.f32 0.001, %v665_v42  ;;  %v667_v9 = vpop.f32.mrb[61].mxu1 }
 0x54e   :  { %v881_v38 = vmul.f32 0.001, %v667_v9  ;;  %v669_v8 = vpop.f32.mrb[62].mxu1 }
 0x54f   :  { %v976_v39 = vsub.f32 %v2052_v43, %v880_v41  ;;  %v886_v7 = vmul.f32 0.001, %v669_v8  ;;  %v671_v5 = vpop.f32.mrb[63].mxu1  ;;  %v2068_v43 = vld [vmem:[#allocation66_spill] sm:$0xff] }
 0x550   :  { %v977_v10 = vsub.f32 %v2053_v3, %v881_v38  ;;  %v887_v6 = vmul.f32 0.001, %v671_v5  ;;  %v2069_v3 = vld [vmem:[#allocation64_spill] sm:$0xff] }
 0x551   :  { %1072 = vst [vmem:[#allocation2 + $0x2b0] sm:$0xff] %v976_v39  ;;  %v982_v52 = vsub.f32 %v2054_v48, %v886_v7  ;;  %v2070_v48 = vld [vmem:[#allocation67_spill] sm:$0xff] }
 0x552   :  { %1073 = vst [vmem:[#allocation2 + $0x2b8] sm:$0xff] %v977_v10  ;;  %v983_v44 = vsub.f32 %v2055_v34, %v887_v6  ;;  %v2071_v34 = vld [vmem:[#allocation65_spill] sm:$0xff] }
 0x553   :  { %1078 = vst [vmem:[#allocation2 + $0x2e0] sm:$0xff] %v982_v52 }
 0x554   :  { %1079 = vst [vmem:[#allocation2 + $0x2e8] sm:$0xff] %v983_v44  ;;  %v708_v53 = vpop.f32.mrb[64].mxu1 }
 0x555   :  { %v798_v49 = vmul.f32 0.001, %v708_v53  ;;  %v710_v45 = vpop.f32.mrb[65].mxu1 }
 0x556   :  { %v799_v17 = vmul.f32 0.001, %v710_v45  ;;  %v712_v35 = vpop.f32.mrb[66].mxu1 }
 0x557   :  { %v894_v26 = vsub.f32 %v2056_v20, %v798_v49  ;;  %v804_v31 = vmul.f32 0.001, %v712_v35  ;;  %v714_v54 = vpop.f32.mrb[67].mxu1  ;;  %v2072_v20 = vld [vmem:[#allocation68_spill] sm:$0xff] }
 0x558   :  { %v895_v25 = vsub.f32 %v2057_v11, %v799_v17  ;;  %v805_v50 = vmul.f32 0.001, %v714_v54  ;;  %v1199_v11 = vld [vmem:[#allocation2 + $0x1a8] sm:$0xff] }
 0x559   :  { %990 = vst [vmem:[#allocation2 + $0x20] sm:$0xff] %v894_v26  ;;  %v900_v55 = vsub.f32 %v2058_v21, %v804_v31  ;;  %v2073_v21 = vld [vmem:[#allocation69_spill] sm:$0xff] }
 0x55a   :  { %991 = vst [vmem:[#allocation2 + $0x28] sm:$0xff] %v895_v25  ;;  %v901_v51 = vsub.f32 %v2059_v12, %v805_v50  ;;  %v1200_v12 = vld [vmem:[#allocation2 + $0x1d8] sm:$0xff] }
 0x55b   :  { %996 = vst [vmem:[#allocation2 + $0x50] sm:$0xff] %v900_v55 }
 0x55c   :  { %997 = vst [vmem:[#allocation2 + $0x58] sm:$0xff] %v901_v51  ;;  %v718_v18 = vpop.f32.mrb[68].mxu1 }
 0x55d   :  { %v810_v22 = vmul.f32 0.001, %v718_v18  ;;  %v720_v16 = vpop.f32.mrb[69].mxu1 }
 0x55e   :  { %v811_v59 = vmul.f32 0.001, %v720_v16  ;;  %v722_v58 = vpop.f32.mrb[70].mxu1 }
 0x55f   :  { %v906_v60 = vsub.f32 %v2060_v27, %v810_v22  ;;  %v816_v46 = vmul.f32 0.001, %v722_v58  ;;  %v724_v63 = vpop.f32.mrb[71].mxu1  ;;  %v1201_v27 = vld [vmem:[#allocation2 + $0x200] sm:$0xff] }
 0x560   :  { %v907_v56 = vsub.f32 %v2061_v23, %v811_v59  ;;  %v817_v19 = vmul.f32 0.001, %v724_v63  ;;  %v1202_v23 = vld [vmem:[#allocation2 + $0x208] sm:$0xff] }
 0x561   :  { %1002 = vst [vmem:[#allocation2 + $0x80] sm:$0xff] %v906_v60  ;;  %v912_v61 = vsub.f32 %v2062_v28, %v816_v46  ;;  %v1203_v28 = vld [vmem:[#allocation2 + $0x230] sm:$0xff] }
 0x562   :  { %1003 = vst [vmem:[#allocation2 + $0x88] sm:$0xff] %v907_v56  ;;  %v913_v47 = vsub.f32 %v2063_v24, %v817_v19  ;;  %v1204_v24 = vld [vmem:[#allocation2 + $0x238] sm:$0xff] }
 0x563   :  { %1008 = vst [vmem:[#allocation2 + $0xb0] sm:$0xff] %v912_v61 }
 0x564   :  { %1009 = vst [vmem:[#allocation2 + $0xb8] sm:$0xff] %v913_v47  ;;  %v728_v14 = vpop.f32.mrb[72].mxu1 }
 0x565   :  { %v822_v2 = vmul.f32 0.001, %v728_v14  ;;  %v730_v33 = vpop.f32.mrb[73].mxu1 }
 0x566   :  { %v823_v62 = vmul.f32 0.001, %v730_v33  ;;  %v732_v36 = vpop.f32.mrb[74].mxu1 }
 0x567   :  { %v918_v32 = vsub.f32 %v2064_v0, %v822_v2  ;;  %v828_v29 = vmul.f32 0.001, %v732_v36  ;;  %v734_v4 = vpop.f32.mrb[75].mxu1  ;;  %v1205_v0 = vld [vmem:[#allocation2 + $0x260] sm:$0xff] }
 0x568   :  { %v919_v30 = vsub.f32 %v2065_v37, %v823_v62  ;;  %v829_v1 = vmul.f32 0.001, %v734_v4  ;;  %v1206_v37 = vld [vmem:[#allocation2 + $0x268] sm:$0xff] }
 0x569   :  { %1014 = vst [vmem:[#allocation2 + $0xe0] sm:$0xff] %v918_v32  ;;  %v924_v15 = vsub.f32 %v2066_v40, %v828_v29  ;;  %v1207_v40 = vld [vmem:[#allocation2 + $0x290] sm:$0xff] }
 0x56a   :  { %1015 = vst [vmem:[#allocation2 + $0xe8] sm:$0xff] %v919_v30  ;;  %v925_v13 = vsub.f32 %v2067_v57, %v829_v1  ;;  %v1208_v57 = vld [vmem:[#allocation2 + $0x298] sm:$0xff] }
 0x56b   :  { %1020 = vst [vmem:[#allocation2 + $0x110] sm:$0xff] %v924_v15 }
 0x56c   :  { %1021 = vst [vmem:[#allocation2 + $0x118] sm:$0xff] %v925_v13  ;;  %v738_v42 = vpop.f32.mrb[76].mxu1 }
 0x56d   :  { %v834_v41 = vmul.f32 0.001, %v738_v42  ;;  %v740_v9 = vpop.f32.mrb[77].mxu1 }
 0x56e   :  { %v835_v38 = vmul.f32 0.001, %v740_v9  ;;  %v742_v8 = vpop.f32.mrb[78].mxu1 }
 0x56f   :  { %v930_v39 = vsub.f32 %v2068_v43, %v834_v41  ;;  %v840_v7 = vmul.f32 0.001, %v742_v8  ;;  %v744_v5 = vpop.f32.mrb[79].mxu1  ;;  %v1209_v43 = vld [vmem:[#allocation2 + $0x2c0] sm:$0xff] }
 0x570   :  { %v931_v10 = vsub.f32 %v2069_v3, %v835_v38  ;;  %v841_v6 = vmul.f32 0.001, %v744_v5  ;;  %v1210_v3 = vld [vmem:[#allocation2 + $0x2c8] sm:$0xff] }
 0x571   :  { %1026 = vst [vmem:[#allocation2 + $0x140] sm:$0xff] %v930_v39  ;;  %v936_v52 = vsub.f32 %v2070_v48, %v840_v7  ;;  %v1211_v48 = vld [vmem:[#allocation2 + $0x2f0] sm:$0xff] }
 0x572   :  { %1027 = vst [vmem:[#allocation2 + $0x148] sm:$0xff] %v931_v10  ;;  %v937_v44 = vsub.f32 %v2071_v34, %v841_v6  ;;  %v1212_v34 = vld [vmem:[#allocation2 + $0x2f8] sm:$0xff] }
 0x573   :  { %1032 = vst [vmem:[#allocation2 + $0x170] sm:$0xff] %v936_v52 }
 0x574   :  { %1033 = vst [vmem:[#allocation2 + $0x178] sm:$0xff] %v937_v44  ;;  %v748_v53 = vpop.f32.mrb[80].mxu1 }
 0x575   :  { %v846_v49 = vmul.f32 0.001, %v748_v53  ;;  %v750_v45 = vpop.f32.mrb[81].mxu1 }
 0x576   :  { %v847_v17 = vmul.f32 0.001, %v750_v45  ;;  %v752_v35 = vpop.f32.mrb[82].mxu1 }
 0x577   :  { %v942_v26 = vsub.f32 %v2072_v20, %v846_v49  ;;  %v852_v31 = vmul.f32 0.001, %v752_v35  ;;  %v754_v54 = vpop.f32.mrb[83].mxu1 }
 0x578   :  { %v943_v25 = vsub.f32 %v1199_v11, %v847_v17  ;;  %v853_v50 = vmul.f32 0.001, %v754_v54 }
 0x579   :  { %1038 = vst [vmem:[#allocation2 + $0x1a0] sm:$0xff] %v942_v26  ;;  %v948_v55 = vsub.f32 %v2073_v21, %v852_v31 }
 0x57a   :  { %1039 = vst [vmem:[#allocation2 + $0x1a8] sm:$0xff] %v943_v25  ;;  %v949_v51 = vsub.f32 %v1200_v12, %v853_v50 }
 0x57b   :  { %1044 = vst [vmem:[#allocation2 + $0x1d0] sm:$0xff] %v948_v55 }
 0x57c   :  { %1045 = vst [vmem:[#allocation2 + $0x1d8] sm:$0xff] %v949_v51  ;;  %v758_v18 = vpop.f32.mrb[84].mxu1 }
 0x57d   :  { %v858_v22 = vmul.f32 0.001, %v758_v18  ;;  %v760_v16 = vpop.f32.mrb[85].mxu1 }
 0x57e   :  { %v859_v59 = vmul.f32 0.001, %v760_v16  ;;  %v762_v58 = vpop.f32.mrb[86].mxu1 }
 0x57f   :  { %v954_v60 = vsub.f32 %v1201_v27, %v858_v22  ;;  %v864_v46 = vmul.f32 0.001, %v762_v58  ;;  %v764_v63 = vpop.f32.mrb[87].mxu1 }
 0x580   :  { %v955_v56 = vsub.f32 %v1202_v23, %v859_v59  ;;  %v865_v19 = vmul.f32 0.001, %v764_v63 }
 0x581   :  { %1050 = vst [vmem:[#allocation2 + $0x200] sm:$0xff] %v954_v60  ;;  %v960_v61 = vsub.f32 %v1203_v28, %v864_v46 }
 0x582   :  { %1051 = vst [vmem:[#allocation2 + $0x208] sm:$0xff] %v955_v56  ;;  %v961_v47 = vsub.f32 %v1204_v24, %v865_v19 }
 0x583   :  { %1056 = vst [vmem:[#allocation2 + $0x230] sm:$0xff] %v960_v61 }
 0x584   :  { %1057 = vst [vmem:[#allocation2 + $0x238] sm:$0xff] %v961_v47  ;;  %v768_v14 = vpop.f32.mrb[88].mxu1 }
 0x585   :  { %v870_v2 = vmul.f32 0.001, %v768_v14  ;;  %v770_v33 = vpop.f32.mrb[89].mxu1 }
 0x586   :  { %v871_v62 = vmul.f32 0.001, %v770_v33  ;;  %v772_v36 = vpop.f32.mrb[90].mxu1 }
 0x587   :  { %v966_v32 = vsub.f32 %v1205_v0, %v870_v2  ;;  %v876_v29 = vmul.f32 0.001, %v772_v36  ;;  %v774_v4 = vpop.f32.mrb[91].mxu1 }
 0x588   :  { %v967_v30 = vsub.f32 %v1206_v37, %v871_v62  ;;  %v877_v1 = vmul.f32 0.001, %v774_v4 }
 0x589   :  { %1062 = vst [vmem:[#allocation2 + $0x260] sm:$0xff] %v966_v32  ;;  %v972_v15 = vsub.f32 %v1207_v40, %v876_v29 }
 0x58a   :  { %1063 = vst [vmem:[#allocation2 + $0x268] sm:$0xff] %v967_v30  ;;  %v973_v13 = vsub.f32 %v1208_v57, %v877_v1 }
 0x58b   :  { %1068 = vst [vmem:[#allocation2 + $0x290] sm:$0xff] %v972_v15 }
 0x58c   :  { %1069 = vst [vmem:[#allocation2 + $0x298] sm:$0xff] %v973_v13  ;;  %v778_v42 = vpop.f32.mrb[92].mxu1 }
 0x58d   :  { %v882_v41 = vmul.f32 0.001, %v778_v42  ;;  %v780_v9 = vpop.f32.mrb[93].mxu1 }
 0x58e   :  { %v883_v38 = vmul.f32 0.001, %v780_v9  ;;  %v782_v8 = vpop.f32.mrb[94].mxu1 }
 0x58f   :  { %v978_v39 = vsub.f32 %v1209_v43, %v882_v41  ;;  %v888_v7 = vmul.f32 0.001, %v782_v8  ;;  %v784_v5 = vpop.f32.mrb[95].mxu1 }
 0x590   :  { %v979_v10 = vsub.f32 %v1210_v3, %v883_v38  ;;  %v889_v6 = vmul.f32 0.001, %v784_v5 }
 0x591   :  { %1074 = vst [vmem:[#allocation2 + $0x2c0] sm:$0xff] %v978_v39  ;;  %v984_v52 = vsub.f32 %v1211_v48, %v888_v7 }
 0x592   :  { %1075 = vst [vmem:[#allocation2 + $0x2c8] sm:$0xff] %v979_v10  ;;  %v985_v44 = vsub.f32 %v1212_v34, %v889_v6 }
 0x593   :  { %1080 = vst [vmem:[#allocation2 + $0x2f0] sm:$0xff] %v984_v52 }
 0x594   :  { %1081 = vst [vmem:[#allocation2 + $0x2f8] sm:$0xff] %v985_v44 }
 0x595   :  { %1268 = shalt.err (!%p1426_p1)  }
 0x596   :  { %s1269_s22 = scalar_lea.hbm %s1926_s4, 12288 }
 0x597   :  { %p1270_p2 = scmp.ne.s32.totalorder %s1926_s4, %s1269_s22  ;;  %p1273_p3 = scmp.lt.u32.totalorder %s1269_s22, %s1926_s4 }
 0x599   :  { %p1275_p4 = pnand %p1273_p3, %p1270_p2 }
 0x59b   :  { %1278 = shalt.err (!%p1275_p4)  }
 0x59c   :  { %1095 = dma.vmem_to_hbm [thread:$0]  %s1411_s11, 12288, %s1926_s4, [#allocation15] }
 0x59d   :  { %1349 = dma.done.wait [#allocation15], 12288 }
 0x59e   :  { %1350 = vsyncadd [#allocation15], 4294955008  ;;  %s1359_s19 = smov [#allocation7]   ;;  %s1360_s30 = smov [#allocation6]  }
 0x59f   :  { %s1118_s29 = sshll.u32 %s1359_s19, 4  ;;  %s1105_s7 = sshll.u32 %s1360_s30, 4  ;;  %s1119_s29 = int_to_ptr.vmem [resolvable:$true] %s1118_s29  ;;  %s1879_s7 = int_to_ptr.vmem [resolvable:$true] %s1105_s7 }
 0x5a0   :  { %s1279_s8 = scalar_lea.vmem %s1119_s29, 16  ;;  %s1283_s9 = scalar_lea.vmem %s1119_s29, 32 }
 0x5a1   :  { %p1280_p5 = scmp.ne.s32.totalorder %s1119_s29, %s1279_s8  ;;  %p1284_p6 = scmp.lt.s32.totalorder %s1119_s29, %s1119_s29 }
 0x5a2   :  { %p1285_p7 = scmp.lt.s32.totalorder %s1283_s9, %s1279_s8 }
 0x5a4   :  { %p1286_p8 = por %p1285_p7, %p1284_p6 }
 0x5a6   :  { %p1287_p9 = pnand %p1286_p8, %p1280_p5 }
 0x5a8   :  { %1290 = shalt.err (!%p1287_p9)
}
 0x5a9   :  { %s1291_s4 = scalar_lea.hbm %s1927_s5, 16 }
 0x5aa   :  { %p1292_p10 = scmp.ne.s32.totalorder %s1927_s5, %s1291_s4  ;;  %p1295_p11 = scmp.lt.u32.totalorder %s1291_s4, %s1927_s5 }
 0x5ac   :  { %p1297_p12 = pnand %p1295_p11, %p1292_p10 }
 0x5ae   :  { %1300 = shalt.err (!%p1297_p12)
}
 0x5af   :  { %1121 = dma.vmem_to_hbm [thread:$0]  %s1119_s29, 16, %s1927_s5, [#allocation8]  }
 0x5b0   :  { %s1301_s18 = scalar_lea.vmem %s1879_s7, 256  ;;  %p1306_p0 = scmp.lt.s32.totalorder %s1879_s7, %s1879_s7 }
 0x5b1   :  { %p1302_p13 = scmp.ne.s32.totalorder %s1879_s7, %s1301_s18  ;;  %p1307_p1 = scmp.lt.s32.totalorder %s1301_s18, %s1301_s18 }
 0x5b3   :  { %p1308_p2 = por %p1307_p1, %p1306_p0 }
 0x5b5   :  { %p1309_p3 = pnand %p1308_p2, %p1302_p13 }
 0x5b7   :  { %1312 = shalt.err (!%p1309_p3)
}
 0x5b8   :  { %s1313_s21 = scalar_lea.hbm %s1925_s3, 256 }
 0x5b9   :  { %p1314_p4 = scmp.ne.s32.totalorder %s1925_s3, %s1313_s21  ;;  %p1317_p5 = scmp.lt.u32.totalorder %s1313_s21, %s1925_s3 }
 0x5bb   :  { %p1319_p6 = pnand %p1317_p5, %p1314_p4 }
 0x5bd   :  { %1322 = shalt.err (!%p1319_p6)
}
 0x5be   :  { %s1361_s5 = smov 128   ;;  %s1362_s24 = smov 8  }
 0x5bf   :  { %1111 = dma.vmem_to_hbm [thread:$0]  %s1879_s7, 256, %s1925_s3, [#allocation5], %s1361_s5, %s1361_s5, %s1362_s24  }
 0x5c0   :  { %s1363_s27 = smov [#allocation9]  }
 0x5c1   :  { %s1128_s28 = sshll.u32 %s1363_s27, 4  ;;  %s1129_s28 = int_to_ptr.vmem [resolvable:$true] %s1128_s28 }
 0x5c2   :  { %s1323_s19 = scalar_lea.vmem %s1129_s28, 16  ;;  %s1327_s29 = scalar_lea.vmem %s1129_s28, 32 }
 0x5c3   :  { %p1324_p7 = scmp.ne.s32.totalorder %s1129_s28, %s1323_s19  ;;  %p1328_p8 = scmp.lt.s32.totalorder %s1129_s28, %s1129_s28 }
 0x5c4   :  { %p1329_p9 = scmp.lt.s32.totalorder %s1327_s29, %s1323_s19 }
 0x5c6   :  { %p1330_p10 = por %p1329_p9, %p1328_p8 }
 0x5c8   :  { %p1331_p11 = pnand %p1330_p10, %p1324_p7 }
 0x5ca   :  { %1334 = shalt.err (!%p1331_p11)
}
 0x5cb   :  { %s1335_s9 = scalar_lea.hbm %s1928_s6, 16 }
 0x5cc   :  { %p1336_p12 = scmp.ne.s32.totalorder %s1928_s6, %s1335_s9  ;;  %p1339_p13 = scmp.lt.u32.totalorder %s1335_s9, %s1928_s6 }
 0x5ce   :  { %p1341_p0 = pnand %p1339_p13, %p1336_p12 }
 0x5d0   :  { %1344 = shalt.err (!%p1341_p0)
}
 0x5d1   :  { %1131 = dma.vmem_to_hbm [thread:$0]  %s1129_s28, 16, %s1928_s6, [#allocation8]  }
 0x5d2   :  { %1351 = dma.done.wait [#allocation5], 256  }
 0x5d3   :  { %1352 = vsyncadd [#allocation5], 4294967040 }
 0x5d4   :  { %1353 = dma.done.wait [#allocation8], 32  }
 0x5d5   :  { %1354 = vsyncadd [#allocation8], 4294967264 }
 0x5d6   :  { %1141 = vsyncpa [#allocation4], 1 }
 0x5d7   :  { %1142 = vsyncpa [#allocation5], 1 }
 0x5d8   :  { %1143 = vsyncpa [#allocation8], 1 }

</bundles_post_ra>
